<compile_context>
chip_gen: v7x
topology: tpu7x:2x2x1
jax: 0.10.0
libtpu: 0.0.40
codegen_flags: <defaults>
</compile_context>

<pallas_src>
import functools
import math

import jax
import jax.numpy as jnp
import numpy as np
from jax import lax
from jax.experimental import pallas as pl
from jax.experimental.pallas import tpu as pltpu


_TAYLOR_COEFFS = tuple(1.0 / math.factorial(k) for k in range(9))  # degree-8
_MAX_SQUARINGS = 10  # handles ||B*B||_1 up to 2^10


def _golem_kernel(s_ref, x_ref, b_ref, m_ref, out_ref, g_ref, e_ref, *,
                  d, lambda_1, lambda_2):
    i = pl.program_id(0)
    nsteps = pl.num_programs(0)

    # ---- per step: Gram accumulation  G += X_tile^T @ X_tile (one MXU op) ---
    @pl.when(i == 0)
    def _init():
        g_ref[...] = jnp.zeros_like(g_ref)

    xt = x_ref[...]                                      # [tile_n, d] f32
    g_ref[...] += lax.dot_general(
        xt, xt, dimension_numbers=(((0,), (0,)), ((), ())),
        preferred_element_type=jnp.float32)

    # ---- finalize: penalties + score (runs once, on the last grid step) -----
    @pl.when(i == nsteps - 1)
    def _finalize():
        B = b_ref[...]                                   # [d, d] f32
        rows = lax.broadcasted_iota(jnp.int32, (d, d), 0)
        cols = lax.broadcasted_iota(jnp.int32, (d, d), 1)
        eye = (rows == cols).astype(jnp.float32)

        # likelihood = 0.5*d*||X - X@B||_F^2 = 0.5*d*trace((I-B)^T G (I-B))
        W = eye - B
        GW = jnp.dot(g_ref[...], W, preferred_element_type=jnp.float32)
        likelihood = jnp.float32(0.5 * d) * jnp.sum(W * GW)

        # L1 penalty
        l1 = jnp.sum(jnp.abs(B))

        # DAG penalty: h = trace(expm(B*B)) - d via scaling & squaring with a
        # degree-8 Taylor core.  M = (B*B) * 2^-s was pre-scaled in the wrapper.
        s = s_ref[0]
        M = m_ref[...]
        c = [jnp.float32(v) for v in _TAYLOR_COEFFS]
        M2 = jnp.dot(M, M, preferred_element_type=jnp.float32)
        M3 = jnp.dot(M2, M, preferred_element_type=jnp.float32)
        M4 = jnp.dot(M2, M2, preferred_element_type=jnp.float32)

        base = (likelihood + jnp.float32(lambda_1) * l1
                - jnp.float32(lambda_2) * jnp.float32(d))
        lam2 = jnp.float32(lambda_2)

        @pl.when(s == 0)
        def _trace_of_powers():
            # trace(sum_k c_k M^k) from traces of powers; tr(A@B) = sum(A*B^T).
            tr = (c[0] * jnp.float32(d)
                  + c[1] * jnp.sum(M * eye)
                  + c[2] * jnp.sum(M * M.T)
                  + c[3] * jnp.sum(M2 * M.T)
                  + c[4] * jnp.sum(M2 * M2.T)
                  + c[5] * jnp.sum(M3 * M2.T)
                  + c[6] * jnp.sum(M3 * M3.T)
                  + c[7] * jnp.sum(M4 * M3.T)
                  + c[8] * jnp.sum(M4 * M4.T))
            out_ref[0] = base + lam2 * tr

        @pl.when(s > 0)
        def _paterson_stockmeyer():
            # E = P0 + M^3 (P1 + M^3 P2), 1/k! folded into constants.
            P0 = c[0] * eye + c[1] * M + c[2] * M2
            P1 = c[3] * eye + c[4] * M + c[5] * M2
            P2 = c[6] * eye + c[7] * M + c[8] * M2
            e_ref[...] = P0 + jnp.dot(
                M3, P1 + jnp.dot(M3, P2, preferred_element_type=jnp.float32),
                preferred_element_type=jnp.float32)

        # First s-1 squarings in place; skipped at runtime when not needed.
        for step in range(_MAX_SQUARINGS - 1):
            @pl.when(step < s - 1)
            def _square():
                Ec = e_ref[...]
                e_ref[...] = jnp.dot(Ec, Ec,
                                     preferred_element_type=jnp.float32)

        @pl.when(s > 0)
        def _last_square_via_trace():
            # Final squaring replaced by trace(E @ E) = sum(E * E^T).
            Ec = e_ref[...]
            out_ref[0] = base + lam2 * jnp.sum(Ec * Ec.T)


def golem_score(X, B, *, lambda_1=2e-2, lambda_2=5.0, max_tile_rows=8192):
    """GOLEM-EV score (scalar) computed in a single Pallas TPU kernel."""
    n, d = X.shape
    assert B.shape == (d, d)
    X32 = X.astype(jnp.float32)
    B32 = B.astype(jnp.float32)

    # Norm-adaptive scaling exponent, computed with jnp so it also works when
    # B is traced (jit / grad): s = ceil(log2(max(||B*B||_1, 1))), capped.
    A = B32 * B32
    norm1 = jnp.max(jnp.sum(A, axis=0))                  # A >= 0 -> 1-norm
    s_f = jnp.clip(jnp.ceil(jnp.log2(jnp.maximum(norm1, jnp.float32(1.0)))),
                   0.0, float(_MAX_SQUARINGS))
    s_arr = s_f.astype(jnp.int32).reshape((1,))
    m_scaled = A * jnp.exp2(-s_f)

    # Row-tiled grid over samples; zero-padded rows contribute exactly 0 to
    # the Gram X^T X.  ~8K-row tiles keep double-buffered VMEM use ~8 MiB,
    # comfortably inside the scoped VMEM default on v5e/v6e/v7x.
    tile_n = min(int(max_tile_rows), ((n + 7) // 8) * 8)
    pad = (-n) % tile_n
    if pad:
        X32 = jnp.pad(X32, ((0, pad), (0, 0)))
    num_tiles = X32.shape[0] // tile_n

    kernel = functools.partial(
        _golem_kernel, d=d, lambda_1=float(lambda_1), lambda_2=float(lambda_2))

    out = pl.pallas_call(
        kernel,
        out_shape=jax.ShapeDtypeStruct((1,), jnp.float32),
        grid_spec=pltpu.PrefetchScalarGridSpec(
            num_scalar_prefetch=1,
            grid=(num_tiles,),
            in_specs=[
                pl.BlockSpec((tile_n, d), lambda i, *_: (i, 0)),  # X row tile
                pl.BlockSpec((d, d), lambda i, *_: (0, 0)),       # B (resident)
                pl.BlockSpec((d, d), lambda i, *_: (0, 0)),       # (B*B)*2^-s
            ],
            out_specs=pl.BlockSpec((1,), lambda i, *_: (0,),
                                   memory_space=pltpu.MemorySpace.SMEM),
            scratch_shapes=[
                pltpu.VMEM((d, d), jnp.float32),   # Gram accumulator G
                pltpu.VMEM((d, d), jnp.float32),   # expm scratch (s > 0 path)
            ],
        ),
        compiler_params=pltpu.CompilerParams(
            dimension_semantics=("arbitrary",)),
    )(s_arr, X32, B32, m_scaled)
    return out[0]


def golem_score_ref(X, B, *, lambda_1=2e-2, lambda_2=5.0):
    """Pure-JAX reference mirroring the PyTorch forward (equal_variances=True)."""
    X = X.astype(jnp.float32)
    B = B.astype(jnp.float32)
    d = B.shape[0]
    R = X - X @ B
    likelihood = 0.5 * d * jnp.sum(R * R)
    l1 = jnp.sum(jnp.abs(B))
    h = jnp.trace(jax.scipy.linalg.expm(B * B)) - d
    return likelihood + lambda_1 * l1 + lambda_2 * h


if __name__ == "__main__":
    # GolemModel(n=128, d=32, lambda_1=2e-2, lambda_2=5.0, equal_variances=True)
    n, d = 128, 32
    lambda_1, lambda_2 = 2e-2, 5.0

    key = jax.random.PRNGKey(0)
    kx, kb = jax.random.split(key)
    X = jax.random.normal(kx, (n, d), dtype=jnp.float32)
    # Deterministic parameter init (module default is zeros; use a small
    # random B_init so the objective is non-trivial).
    B = 0.05 * jax.random.normal(kb, (d, d), dtype=jnp.float32)

    score = golem_score(X, B, lambda_1=lambda_1, lambda_2=lambda_2)
    score = jax.block_until_ready(score)

    score_ref = jax.block_until_ready(
        golem_score_ref(X, B, lambda_1=lambda_1, lambda_2=lambda_2))

    np.testing.assert_allclose(np.asarray(score), np.asarray(score_ref),
                               rtol=2e-2, atol=2e-2)
    print("KERNEL_OK")
</pallas_src>

<mosaic_0001>
module attributes {stable_mosaic.version = 11 : i64} {
  func.func @_golem_kernel(%arg0: i32, %arg1: memref<1xi32, #tpu.memory_space<smem>>, %arg2: memref<128x32xf32, #tpu.memory_space<vmem>>, %arg3: memref<32x32xf32, #tpu.memory_space<vmem>>, %arg4: memref<32x32xf32, #tpu.memory_space<vmem>>, %arg5: memref<1xf32, #tpu.memory_space<smem>>, %arg6: memref<32x32xf32, #tpu.memory_space<vmem>>, %arg7: memref<32x32xf32, #tpu.memory_space<vmem>>) attributes {dimension_semantics = [#tpu.dimension_semantics<arbitrary>], iteration_bounds = array<i64: 1>, scalar_prefetch = 1 : i64, scratch_operands = 2 : i64, tpu.core_type = #tpu.core_type<tc>, window_params = [{transform_indices = @transform_0, window_bounds = array<i64: 128, 32>}, {pipeline_mode = #tpu.pipeline_mode<synchronous>, transform_indices = @transform_1, window_bounds = array<i64: 32, 32>}, {pipeline_mode = #tpu.pipeline_mode<synchronous>, transform_indices = @transform_2, window_bounds = array<i64: 32, 32>}, {transform_indices = @transform_3, window_bounds = array<i64: 1>}]} {
    %c0_i32 = arith.constant 0 : i32
    %0 = arith.cmpi eq, %arg0, %c0_i32 : i32
    %1 = arith.extui %0 : i1 to i32
    %c0_i32_0 = arith.constant 0 : i32
    %2 = arith.cmpi ne, %1, %c0_i32_0 : i32
    scf.if %2 {
      %cst_8 = arith.constant 0.000000e+00 : f32
      %11 = vector.broadcast %cst_8 : f32 to vector<32x32xf32>
      %c0_9 = arith.constant 0 : index
      %c0_10 = arith.constant 0 : index
      %12 = vector.load %arg6[%c0_9, %c0_10] : memref<32x32xf32, #tpu.memory_space<vmem>>, vector<32x32xf32>
      tpu.vector_store %arg6[%c0_9, %c0_10], %11 {strides = array<i32>} : memref<32x32xf32, #tpu.memory_space<vmem>>, vector<32x32xf32>,
    } else {
    }
    %c0 = arith.constant 0 : index
    %c0_1 = arith.constant 0 : index
    %3 = vector.load %arg2[%c0, %c0_1] : memref<128x32xf32, #tpu.memory_space<vmem>>, vector<128x32xf32>
    %c0_2 = arith.constant 0 : index
    %c0_3 = arith.constant 0 : index
    %4 = vector.load %arg6[%c0_2, %c0_3] : memref<32x32xf32, #tpu.memory_space<vmem>>, vector<32x32xf32>
    %cst = arith.constant dense<0.000000e+00> : vector<32x32xf32>
    %5 = tpu.matmul %3, %3, %cst {dimension_numbers = #tpu.dot_dimension_numbers<[0], [0], [1], [1], [0, 1, 1, 1], [], []>} : vector<128x32xf32>, vector<128x32xf32>, vector<32x32xf32> -> vector<32x32xf32>
    %6 = arith.addf %4, %5 : vector<32x32xf32>
    %c0_4 = arith.constant 0 : index
    %c0_5 = arith.constant 0 : index
    %7 = vector.load %arg6[%c0_4, %c0_5] : memref<32x32xf32, #tpu.memory_space<vmem>>, vector<32x32xf32>
    tpu.vector_store %arg6[%c0_4, %c0_5], %6 {strides = array<i32>} : memref<32x32xf32, #tpu.memory_space<vmem>>, vector<32x32xf32>,
    %c0_i32_6 = arith.constant 0 : i32
    %8 = arith.cmpi eq, %arg0, %c0_i32_6 : i32
    %9 = arith.extui %8 : i1 to i32
    %c0_i32_7 = arith.constant 0 : i32
    %10 = arith.cmpi ne, %9, %c0_i32_7 : i32
    scf.if %10 {
      %c0_8 = arith.constant 0 : index
      %c0_9 = arith.constant 0 : index
      %11 = vector.load %arg3[%c0_8, %c0_9] : memref<32x32xf32, #tpu.memory_space<vmem>>, vector<32x32xf32>
      %12 = tpu.iota {dimensions = array<i32: 0>} : vector<32x32xi32>
      %13 = tpu.iota {dimensions = array<i32: 1>} : vector<32x32xi32>
      %14 = arith.cmpi eq, %12, %13 : vector<32x32xi32>
      %15 = arith.extui %14 : vector<32x32xi1> to vector<32x32xi32>
      %16 = arith.sitofp %15 : vector<32x32xi32> to vector<32x32xf32>
      %17 = arith.subf %16, %11 : vector<32x32xf32>
      %c0_10 = arith.constant 0 : index
      %c0_11 = arith.constant 0 : index
      %18 = vector.load %arg6[%c0_10, %c0_11] : memref<32x32xf32, #tpu.memory_space<vmem>>, vector<32x32xf32>
      %cst_12 = arith.constant dense<0.000000e+00> : vector<32x32xf32>
      %19 = tpu.matmul %18, %17, %cst_12 {dimension_numbers = #tpu.dot_dimension_numbers<[1], [0], [0], [1], [0, 0, 1, 1], [], []>} : vector<32x32xf32>, vector<32x32xf32>, vector<32x32xf32> -> vector<32x32xf32>
      %20 = arith.mulf %17, %19 : vector<32x32xf32>
      %21 = vector.shape_cast %20 : vector<32x32xf32> to vector<1x32x32xf32>
      %cst_13 = arith.constant dense<0.000000e+00> : vector<1xf32>
      %22 = vector.multi_reduction <add>, %21, %cst_13 [1, 2] : vector<1x32x32xf32> to vector<1xf32>
      %23 = vector.shape_cast %22 : vector<1xf32> to vector<1x1x1xf32>
      %24 = vector.extract %23[0, 0, 0] : f32 from vector<1x1x1xf32>
      %cst_14 = arith.constant 1.600000e+01 : f32
      %25 = arith.mulf %cst_14, %24 : f32
      %26 = math.absf %11 : vector<32x32xf32>
      %27 = vector.shape_cast %26 : vector<32x32xf32> to vector<1x32x32xf32>
      %cst_15 = arith.constant dense<0.000000e+00> : vector<1xf32>
      %28 = vector.multi_reduction <add>, %27, %cst_15 [1, 2] : vector<1x32x32xf32> to vector<1xf32>
      %29 = vector.shape_cast %28 : vector<1xf32> to vector<1x1x1xf32>
      %30 = vector.extract %29[0, 0, 0] : f32 from vector<1x1x1xf32>
      %c0_16 = arith.constant 0 : index
      %31 = memref.load %arg1[%c0_16] : memref<1xi32, #tpu.memory_space<smem>>
      %c0_17 = arith.constant 0 : index
      %c0_18 = arith.constant 0 : index
      %32 = vector.load %arg4[%c0_17, %c0_18] : memref<32x32xf32, #tpu.memory_space<vmem>>, vector<32x32xf32>
      %cst_19 = arith.constant dense<0.000000e+00> : vector<32x32xf32>
      %33 = tpu.matmul %32, %32, %cst_19 {dimension_numbers = #tpu.dot_dimension_numbers<[1], [0], [0], [1], [0, 0, 1, 1], [], []>} : vector<32x32xf32>, vector<32x32xf32>, vector<32x32xf32> -> vector<32x32xf32>
      %cst_20 = arith.constant dense<0.000000e+00> : vector<32x32xf32>
      %34 = tpu.matmul %33, %32, %cst_20 {dimension_numbers = #tpu.dot_dimension_numbers<[1], [0], [0], [1], [0, 0, 1, 1], [], []>} : vector<32x32xf32>, vector<32x32xf32>, vector<32x32xf32> -> vector<32x32xf32>
      %cst_21 = arith.constant dense<0.000000e+00> : vector<32x32xf32>
      %35 = tpu.matmul %33, %33, %cst_21 {dimension_numbers = #tpu.dot_dimension_numbers<[1], [0], [0], [1], [0, 0, 1, 1], [], []>} : vector<32x32xf32>, vector<32x32xf32>, vector<32x32xf32> -> vector<32x32xf32>
      %cst_22 = arith.constant 2.000000e-02 : f32
      %36 = arith.mulf %cst_22, %30 : f32
      %37 = arith.addf %25, %36 : f32
      %cst_23 = arith.constant 5.000000e+00 : f32
      %cst_24 = arith.constant 3.200000e+01 : f32
      %38 = arith.mulf %cst_23, %cst_24 : f32
      %39 = arith.subf %37, %38 : f32
      %c0_i32_25 = arith.constant 0 : i32
      %40 = arith.cmpi eq, %31, %c0_i32_25 : i32
      %41 = arith.extui %40 : i1 to i32
      %cst_26 = arith.constant 1.000000e+00 : f32
      %cst_27 = arith.constant 1.000000e+00 : f32
      %cst_28 = arith.constant 5.000000e-01 : f32
      %cst_29 = arith.constant 0.166666672 : f32
      %cst_30 = arith.constant 0.0416666679 : f32
      %cst_31 = arith.constant 0.00833333377 : f32
      %cst_32 = arith.constant 0.00138888892 : f32
      %cst_33 = arith.constant 1.98412701E-4 : f32
      %cst_34 = arith.constant 2.48015876E-5 : f32
      %cst_35 = arith.constant 5.000000e+00 : f32
      %c0_i32_36 = arith.constant 0 : i32
      %42 = arith.cmpi ne, %41, %c0_i32_36 : i32
      scf.if %42 {
        %cst_70 = arith.constant 3.200000e+01 : f32
        %85 = arith.mulf %cst_26, %cst_70 : f32
        %86 = arith.mulf %32, %16 : vector<32x32xf32>
        %87 = vector.shape_cast %86 : vector<32x32xf32> to vector<1x32x32xf32>
        %cst_71 = arith.constant dense<0.000000e+00> : vector<1xf32>
        %88 = vector.multi_reduction <add>, %87, %cst_71 [1, 2] : vector<1x32x32xf32> to vector<1xf32>
        %89 = vector.shape_cast %88 : vector<1xf32> to vector<1x1x1xf32>
        %90 = vector.extract %89[0, 0, 0] : f32 from vector<1x1x1xf32>
        %91 = arith.mulf %cst_27, %90 : f32
        %92 = arith.addf %85, %91 : f32
        %93 = tpu.transpose %32, [1, 0] : vector<32x32xf32> -> vector<32x32xf32>
        %94 = arith.mulf %32, %93 : vector<32x32xf32>
        %95 = vector.shape_cast %94 : vector<32x32xf32> to vector<1x32x32xf32>
        %cst_72 = arith.constant dense<0.000000e+00> : vector<1xf32>
        %96 = vector.multi_reduction <add>, %95, %cst_72 [1, 2] : vector<1x32x32xf32> to vector<1xf32>
        %97 = vector.shape_cast %96 : vector<1xf32> to vector<1x1x1xf32>
        %98 = vector.extract %97[0, 0, 0] : f32 from vector<1x1x1xf32>
        %99 = arith.mulf %cst_28, %98 : f32
        %100 = arith.addf %92, %99 : f32
        %101 = tpu.transpose %32, [1, 0] : vector<32x32xf32> -> vector<32x32xf32>
        %102 = arith.mulf %33, %101 : vector<32x32xf32>
        %103 = vector.shape_cast %102 : vector<32x32xf32> to vector<1x32x32xf32>
        %cst_73 = arith.constant dense<0.000000e+00> : vector<1xf32>
        %104 = vector.multi_reduction <add>, %103, %cst_73 [1, 2] : vector<1x32x32xf32> to vector<1xf32>
        %105 = vector.shape_cast %104 : vector<1xf32> to vector<1x1x1xf32>
        %106 = vector.extract %105[0, 0, 0] : f32 from vector<1x1x1xf32>
        %107 = arith.mulf %cst_29, %106 : f32
        %108 = arith.addf %100, %107 : f32
        %109 = tpu.transpose %33, [1, 0] : vector<32x32xf32> -> vector<32x32xf32>
        %110 = arith.mulf %33, %109 : vector<32x32xf32>
        %111 = vector.shape_cast %110 : vector<32x32xf32> to vector<1x32x32xf32>
        %cst_74 = arith.constant dense<0.000000e+00> : vector<1xf32>
        %112 = vector.multi_reduction <add>, %111, %cst_74 [1, 2] : vector<1x32x32xf32> to vector<1xf32>
        %113 = vector.shape_cast %112 : vector<1xf32> to vector<1x1x1xf32>
        %114 = vector.extract %113[0, 0, 0] : f32 from vector<1x1x1xf32>
        %115 = arith.mulf %cst_30, %114 : f32
        %116 = arith.addf %108, %115 : f32
        %117 = tpu.transpose %33, [1, 0] : vector<32x32xf32> -> vector<32x32xf32>
        %118 = arith.mulf %34, %117 : vector<32x32xf32>
        %119 = vector.shape_cast %118 : vector<32x32xf32> to vector<1x32x32xf32>
        %cst_75 = arith.constant dense<0.000000e+00> : vector<1xf32>
        %120 = vector.multi_reduction <add>, %119, %cst_75 [1, 2] : vector<1x32x32xf32> to vector<1xf32>
        %121 = vector.shape_cast %120 : vector<1xf32> to vector<1x1x1xf32>
        %122 = vector.extract %121[0, 0, 0] : f32 from vector<1x1x1xf32>
        %123 = arith.mulf %cst_31, %122 : f32
        %124 = arith.addf %116, %123 : f32
        %125 = tpu.transpose %34, [1, 0] : vector<32x32xf32> -> vector<32x32xf32>
        %126 = arith.mulf %34, %125 : vector<32x32xf32>
        %127 = vector.shape_cast %126 : vector<32x32xf32> to vector<1x32x32xf32>
        %cst_76 = arith.constant dense<0.000000e+00> : vector<1xf32>
        %128 = vector.multi_reduction <add>, %127, %cst_76 [1, 2] : vector<1x32x32xf32> to vector<1xf32>
        %129 = vector.shape_cast %128 : vector<1xf32> to vector<1x1x1xf32>
        %130 = vector.extract %129[0, 0, 0] : f32 from vector<1x1x1xf32>
        %131 = arith.mulf %cst_32, %130 : f32
        %132 = arith.addf %124, %131 : f32
        %133 = tpu.transpose %34, [1, 0] : vector<32x32xf32> -> vector<32x32xf32>
        %134 = arith.mulf %35, %133 : vector<32x32xf32>
        %135 = vector.shape_cast %134 : vector<32x32xf32> to vector<1x32x32xf32>
        %cst_77 = arith.constant dense<0.000000e+00> : vector<1xf32>
        %136 = vector.multi_reduction <add>, %135, %cst_77 [1, 2] : vector<1x32x32xf32> to vector<1xf32>
        %137 = vector.shape_cast %136 : vector<1xf32> to vector<1x1x1xf32>
        %138 = vector.extract %137[0, 0, 0] : f32 from vector<1x1x1xf32>
        %139 = arith.mulf %cst_33, %138 : f32
        %140 = arith.addf %132, %139 : f32
        %141 = tpu.transpose %35, [1, 0] : vector<32x32xf32> -> vector<32x32xf32>
        %142 = arith.mulf %35, %141 : vector<32x32xf32>
        %143 = vector.shape_cast %142 : vector<32x32xf32> to vector<1x32x32xf32>
        %cst_78 = arith.constant dense<0.000000e+00> : vector<1xf32>
        %144 = vector.multi_reduction <add>, %143, %cst_78 [1, 2] : vector<1x32x32xf32> to vector<1xf32>
        %145 = vector.shape_cast %144 : vector<1xf32> to vector<1x1x1xf32>
        %146 = vector.extract %145[0, 0, 0] : f32 from vector<1x1x1xf32>
        %147 = arith.mulf %cst_34, %146 : f32
        %148 = arith.addf %140, %147 : f32
        %149 = arith.mulf %cst_35, %148 : f32
        %150 = arith.addf %39, %149 : f32
        %c0_79 = arith.constant 0 : index
        %151 = memref.load %arg5[%c0_79] : memref<1xf32, #tpu.memory_space<smem>>
        memref.store %150, %arg5[%c0_79] : memref<1xf32, #tpu.memory_space<smem>>
      } else {
      }
      %c0_i32_37 = arith.constant 0 : i32
      %43 = arith.cmpi sgt, %31, %c0_i32_37 : i32
      %44 = arith.extui %43 : i1 to i32
      %cst_38 = arith.constant 1.000000e+00 : f32
      %cst_39 = arith.constant 1.000000e+00 : f32
      %cst_40 = arith.constant 5.000000e-01 : f32
      %cst_41 = arith.constant 0.166666672 : f32
      %cst_42 = arith.constant 0.0416666679 : f32
      %cst_43 = arith.constant 0.00833333377 : f32
      %cst_44 = arith.constant 0.00138888892 : f32
      %cst_45 = arith.constant 1.98412701E-4 : f32
      %cst_46 = arith.constant 2.48015876E-5 : f32
      %c0_i32_47 = arith.constant 0 : i32
      %45 = arith.cmpi ne, %44, %c0_i32_47 : i32
      scf.if %45 {
        %85 = vector.broadcast %cst_38 : f32 to vector<32x32xf32>
        %86 = arith.mulf %85, %16 : vector<32x32xf32>
        %87 = vector.broadcast %cst_39 : f32 to vector<32x32xf32>
        %88 = arith.mulf %87, %32 : vector<32x32xf32>
        %89 = arith.addf %86, %88 : vector<32x32xf32>
        %90 = vector.broadcast %cst_40 : f32 to vector<32x32xf32>
        %91 = arith.mulf %90, %33 : vector<32x32xf32>
        %92 = arith.addf %89, %91 : vector<32x32xf32>
        %93 = vector.broadcast %cst_41 : f32 to vector<32x32xf32>
        %94 = arith.mulf %93, %16 : vector<32x32xf32>
        %95 = vector.broadcast %cst_42 : f32 to vector<32x32xf32>
        %96 = arith.mulf %95, %32 : vector<32x32xf32>
        %97 = arith.addf %94, %96 : vector<32x32xf32>
        %98 = vector.broadcast %cst_43 : f32 to vector<32x32xf32>
        %99 = arith.mulf %98, %33 : vector<32x32xf32>
        %100 = arith.addf %97, %99 : vector<32x32xf32>
        %101 = vector.broadcast %cst_44 : f32 to vector<32x32xf32>
        %102 = arith.mulf %101, %16 : vector<32x32xf32>
        %103 = vector.broadcast %cst_45 : f32 to vector<32x32xf32>
        %104 = arith.mulf %103, %32 : vector<32x32xf32>
        %105 = arith.addf %102, %104 : vector<32x32xf32>
        %106 = vector.broadcast %cst_46 : f32 to vector<32x32xf32>
        %107 = arith.mulf %106, %33 : vector<32x32xf32>
        %108 = arith.addf %105, %107 : vector<32x32xf32>
        %cst_70 = arith.constant dense<0.000000e+00> : vector<32x32xf32>
        %109 = tpu.matmul %34, %108, %cst_70 {dimension_numbers = #tpu.dot_dimension_numbers<[1], [0], [0], [1], [0, 0, 1, 1], [], []>} : vector<32x32xf32>, vector<32x32xf32>, vector<32x32xf32> -> vector<32x32xf32>
        %110 = arith.addf %100, %109 : vector<32x32xf32>
        %cst_71 = arith.constant dense<0.000000e+00> : vector<32x32xf32>
        %111 = tpu.matmul %34, %110, %cst_71 {dimension_numbers = #tpu.dot_dimension_numbers<[1], [0], [0], [1], [0, 0, 1, 1], [], []>} : vector<32x32xf32>, vector<32x32xf32>, vector<32x32xf32> -> vector<32x32xf32>
        %112 = arith.addf %92, %111 : vector<32x32xf32>
        %c0_72 = arith.constant 0 : index
        %c0_73 = arith.constant 0 : index
        %113 = vector.load %arg7[%c0_72, %c0_73] : memref<32x32xf32, #tpu.memory_space<vmem>>, vector<32x32xf32>
        tpu.vector_store %arg7[%c0_72, %c0_73], %112 {strides = array<i32>} : memref<32x32xf32, #tpu.memory_space<vmem>>, vector<32x32xf32>,
      } else {
      }
      %c1_i32 = arith.constant 1 : i32
      %46 = arith.subi %31, %c1_i32 : i32
      %c0_i32_48 = arith.constant 0 : i32
      %47 = arith.cmpi sgt, %46, %c0_i32_48 : i32
      %48 = arith.extui %47 : i1 to i32
      %c0_i32_49 = arith.constant 0 : i32
      %49 = arith.cmpi ne, %48, %c0_i32_49 : i32
      scf.if %49 {
        %c0_70 = arith.constant 0 : index
        %c0_71 = arith.constant 0 : index
        %85 = vector.load %arg7[%c0_70, %c0_71] : memref<32x32xf32, #tpu.memory_space<vmem>>, vector<32x32xf32>
        %cst_72 = arith.constant dense<0.000000e+00> : vector<32x32xf32>
        %86 = tpu.matmul %85, %85, %cst_72 {dimension_numbers = #tpu.dot_dimension_numbers<[1], [0], [0], [1], [0, 0, 1, 1], [], []>} : vector<32x32xf32>, vector<32x32xf32>, vector<32x32xf32> -> vector<32x32xf32>
        %c0_73 = arith.constant 0 : index
        %c0_74 = arith.constant 0 : index
        %87 = vector.load %arg7[%c0_73, %c0_74] : memref<32x32xf32, #tpu.memory_space<vmem>>, vector<32x32xf32>
        tpu.vector_store %arg7[%c0_73, %c0_74], %86 {strides = array<i32>} : memref<32x32xf32, #tpu.memory_space<vmem>>, vector<32x32xf32>,
      } else {
      }
      %c1_i32_50 = arith.constant 1 : i32
      %50 = arith.subi %31, %c1_i32_50 : i32
      %c1_i32_51 = arith.constant 1 : i32
      %51 = arith.cmpi sgt, %50, %c1_i32_51 : i32
      %52 = arith.extui %51 : i1 to i32
      %c0_i32_52 = arith.constant 0 : i32
      %53 = arith.cmpi ne, %52, %c0_i32_52 : i32
      scf.if %53 {
        %c0_70 = arith.constant 0 : index
        %c0_71 = arith.constant 0 : index
        %85 = vector.load %arg7[%c0_70, %c0_71] : memref<32x32xf32, #tpu.memory_space<vmem>>, vector<32x32xf32>
        %cst_72 = arith.constant dense<0.000000e+00> : vector<32x32xf32>
        %86 = tpu.matmul %85, %85, %cst_72 {dimension_numbers = #tpu.dot_dimension_numbers<[1], [0], [0], [1], [0, 0, 1, 1], [], []>} : vector<32x32xf32>, vector<32x32xf32>, vector<32x32xf32> -> vector<32x32xf32>
        %c0_73 = arith.constant 0 : index
        %c0_74 = arith.constant 0 : index
        %87 = vector.load %arg7[%c0_73, %c0_74] : memref<32x32xf32, #tpu.memory_space<vmem>>, vector<32x32xf32>
        tpu.vector_store %arg7[%c0_73, %c0_74], %86 {strides = array<i32>} : memref<32x32xf32, #tpu.memory_space<vmem>>, vector<32x32xf32>,
      } else {
      }
      %c1_i32_53 = arith.constant 1 : i32
      %54 = arith.subi %31, %c1_i32_53 : i32
      %c2_i32 = arith.constant 2 : i32
      %55 = arith.cmpi sgt, %54, %c2_i32 : i32
      %56 = arith.extui %55 : i1 to i32
      %c0_i32_54 = arith.constant 0 : i32
      %57 = arith.cmpi ne, %56, %c0_i32_54 : i32
      scf.if %57 {
        %c0_70 = arith.constant 0 : index
        %c0_71 = arith.constant 0 : index
        %85 = vector.load %arg7[%c0_70, %c0_71] : memref<32x32xf32, #tpu.memory_space<vmem>>, vector<32x32xf32>
        %cst_72 = arith.constant dense<0.000000e+00> : vector<32x32xf32>
        %86 = tpu.matmul %85, %85, %cst_72 {dimension_numbers = #tpu.dot_dimension_numbers<[1], [0], [0], [1], [0, 0, 1, 1], [], []>} : vector<32x32xf32>, vector<32x32xf32>, vector<32x32xf32> -> vector<32x32xf32>
        %c0_73 = arith.constant 0 : index
        %c0_74 = arith.constant 0 : index
        %87 = vector.load %arg7[%c0_73, %c0_74] : memref<32x32xf32, #tpu.memory_space<vmem>>, vector<32x32xf32>
        tpu.vector_store %arg7[%c0_73, %c0_74], %86 {strides = array<i32>} : memref<32x32xf32, #tpu.memory_space<vmem>>, vector<32x32xf32>,
      } else {
      }
      %c1_i32_55 = arith.constant 1 : i32
      %58 = arith.subi %31, %c1_i32_55 : i32
      %c3_i32 = arith.constant 3 : i32
      %59 = arith.cmpi sgt, %58, %c3_i32 : i32
      %60 = arith.extui %59 : i1 to i32
      %c0_i32_56 = arith.constant 0 : i32
      %61 = arith.cmpi ne, %60, %c0_i32_56 : i32
      scf.if %61 {
        %c0_70 = arith.constant 0 : index
        %c0_71 = arith.constant 0 : index
        %85 = vector.load %arg7[%c0_70, %c0_71] : memref<32x32xf32, #tpu.memory_space<vmem>>, vector<32x32xf32>
        %cst_72 = arith.constant dense<0.000000e+00> : vector<32x32xf32>
        %86 = tpu.matmul %85, %85, %cst_72 {dimension_numbers = #tpu.dot_dimension_numbers<[1], [0], [0], [1], [0, 0, 1, 1], [], []>} : vector<32x32xf32>, vector<32x32xf32>, vector<32x32xf32> -> vector<32x32xf32>
        %c0_73 = arith.constant 0 : index
        %c0_74 = arith.constant 0 : index
        %87 = vector.load %arg7[%c0_73, %c0_74] : memref<32x32xf32, #tpu.memory_space<vmem>>, vector<32x32xf32>
        tpu.vector_store %arg7[%c0_73, %c0_74], %86 {strides = array<i32>} : memref<32x32xf32, #tpu.memory_space<vmem>>, vector<32x32xf32>,
      } else {
      }
      %c1_i32_57 = arith.constant 1 : i32
      %62 = arith.subi %31, %c1_i32_57 : i32
      %c4_i32 = arith.constant 4 : i32
      %63 = arith.cmpi sgt, %62, %c4_i32 : i32
      %64 = arith.extui %63 : i1 to i32
      %c0_i32_58 = arith.constant 0 : i32
      %65 = arith.cmpi ne, %64, %c0_i32_58 : i32
      scf.if %65 {
        %c0_70 = arith.constant 0 : index
        %c0_71 = arith.constant 0 : index
        %85 = vector.load %arg7[%c0_70, %c0_71] : memref<32x32xf32, #tpu.memory_space<vmem>>, vector<32x32xf32>
        %cst_72 = arith.constant dense<0.000000e+00> : vector<32x32xf32>
        %86 = tpu.matmul %85, %85, %cst_72 {dimension_numbers = #tpu.dot_dimension_numbers<[1], [0], [0], [1], [0, 0, 1, 1], [], []>} : vector<32x32xf32>, vector<32x32xf32>, vector<32x32xf32> -> vector<32x32xf32>
        %c0_73 = arith.constant 0 : index
        %c0_74 = arith.constant 0 : index
        %87 = vector.load %arg7[%c0_73, %c0_74] : memref<32x32xf32, #tpu.memory_space<vmem>>, vector<32x32xf32>
        tpu.vector_store %arg7[%c0_73, %c0_74], %86 {strides = array<i32>} : memref<32x32xf32, #tpu.memory_space<vmem>>, vector<32x32xf32>,
      } else {
      }
      %c1_i32_59 = arith.constant 1 : i32
      %66 = arith.subi %31, %c1_i32_59 : i32
      %c5_i32 = arith.constant 5 : i32
      %67 = arith.cmpi sgt, %66, %c5_i32 : i32
      %68 = arith.extui %67 : i1 to i32
      %c0_i32_60 = arith.constant 0 : i32
      %69 = arith.cmpi ne, %68, %c0_i32_60 : i32
      scf.if %69 {
        %c0_70 = arith.constant 0 : index
        %c0_71 = arith.constant 0 : index
        %85 = vector.load %arg7[%c0_70, %c0_71] : memref<32x32xf32, #tpu.memory_space<vmem>>, vector<32x32xf32>
        %cst_72 = arith.constant dense<0.000000e+00> : vector<32x32xf32>
        %86 = tpu.matmul %85, %85, %cst_72 {dimension_numbers = #tpu.dot_dimension_numbers<[1], [0], [0], [1], [0, 0, 1, 1], [], []>} : vector<32x32xf32>, vector<32x32xf32>, vector<32x32xf32> -> vector<32x32xf32>
        %c0_73 = arith.constant 0 : index
        %c0_74 = arith.constant 0 : index
        %87 = vector.load %arg7[%c0_73, %c0_74] : memref<32x32xf32, #tpu.memory_space<vmem>>, vector<32x32xf32>
        tpu.vector_store %arg7[%c0_73, %c0_74], %86 {strides = array<i32>} : memref<32x32xf32, #tpu.memory_space<vmem>>, vector<32x32xf32>,
      } else {
      }
      %c1_i32_61 = arith.constant 1 : i32
      %70 = arith.subi %31, %c1_i32_61 : i32
      %c6_i32 = arith.constant 6 : i32
      %71 = arith.cmpi sgt, %70, %c6_i32 : i32
      %72 = arith.extui %71 : i1 to i32
      %c0_i32_62 = arith.constant 0 : i32
      %73 = arith.cmpi ne, %72, %c0_i32_62 : i32
      scf.if %73 {
        %c0_70 = arith.constant 0 : index
        %c0_71 = arith.constant 0 : index
        %85 = vector.load %arg7[%c0_70, %c0_71] : memref<32x32xf32, #tpu.memory_space<vmem>>, vector<32x32xf32>
        %cst_72 = arith.constant dense<0.000000e+00> : vector<32x32xf32>
        %86 = tpu.matmul %85, %85, %cst_72 {dimension_numbers = #tpu.dot_dimension_numbers<[1], [0], [0], [1], [0, 0, 1, 1], [], []>} : vector<32x32xf32>, vector<32x32xf32>, vector<32x32xf32> -> vector<32x32xf32>
        %c0_73 = arith.constant 0 : index
        %c0_74 = arith.constant 0 : index
        %87 = vector.load %arg7[%c0_73, %c0_74] : memref<32x32xf32, #tpu.memory_space<vmem>>, vector<32x32xf32>
        tpu.vector_store %arg7[%c0_73, %c0_74], %86 {strides = array<i32>} : memref<32x32xf32, #tpu.memory_space<vmem>>, vector<32x32xf32>,
      } else {
      }
      %c1_i32_63 = arith.constant 1 : i32
      %74 = arith.subi %31, %c1_i32_63 : i32
      %c7_i32 = arith.constant 7 : i32
      %75 = arith.cmpi sgt, %74, %c7_i32 : i32
      %76 = arith.extui %75 : i1 to i32
      %c0_i32_64 = arith.constant 0 : i32
      %77 = arith.cmpi ne, %76, %c0_i32_64 : i32
      scf.if %77 {
        %c0_70 = arith.constant 0 : index
        %c0_71 = arith.constant 0 : index
        %85 = vector.load %arg7[%c0_70, %c0_71] : memref<32x32xf32, #tpu.memory_space<vmem>>, vector<32x32xf32>
        %cst_72 = arith.constant dense<0.000000e+00> : vector<32x32xf32>
        %86 = tpu.matmul %85, %85, %cst_72 {dimension_numbers = #tpu.dot_dimension_numbers<[1], [0], [0], [1], [0, 0, 1, 1], [], []>} : vector<32x32xf32>, vector<32x32xf32>, vector<32x32xf32> -> vector<32x32xf32>
        %c0_73 = arith.constant 0 : index
        %c0_74 = arith.constant 0 : index
        %87 = vector.load %arg7[%c0_73, %c0_74] : memref<32x32xf32, #tpu.memory_space<vmem>>, vector<32x32xf32>
        tpu.vector_store %arg7[%c0_73, %c0_74], %86 {strides = array<i32>} : memref<32x32xf32, #tpu.memory_space<vmem>>, vector<32x32xf32>,
      } else {
      }
      %c1_i32_65 = arith.constant 1 : i32
      %78 = arith.subi %31, %c1_i32_65 : i32
      %c8_i32 = arith.constant 8 : i32
      %79 = arith.cmpi sgt, %78, %c8_i32 : i32
      %80 = arith.extui %79 : i1 to i32
      %c0_i32_66 = arith.constant 0 : i32
      %81 = arith.cmpi ne, %80, %c0_i32_66 : i32
      scf.if %81 {
        %c0_70 = arith.constant 0 : index
        %c0_71 = arith.constant 0 : index
        %85 = vector.load %arg7[%c0_70, %c0_71] : memref<32x32xf32, #tpu.memory_space<vmem>>, vector<32x32xf32>
        %cst_72 = arith.constant dense<0.000000e+00> : vector<32x32xf32>
        %86 = tpu.matmul %85, %85, %cst_72 {dimension_numbers = #tpu.dot_dimension_numbers<[1], [0], [0], [1], [0, 0, 1, 1], [], []>} : vector<32x32xf32>, vector<32x32xf32>, vector<32x32xf32> -> vector<32x32xf32>
        %c0_73 = arith.constant 0 : index
        %c0_74 = arith.constant 0 : index
        %87 = vector.load %arg7[%c0_73, %c0_74] : memref<32x32xf32, #tpu.memory_space<vmem>>, vector<32x32xf32>
        tpu.vector_store %arg7[%c0_73, %c0_74], %86 {strides = array<i32>} : memref<32x32xf32, #tpu.memory_space<vmem>>, vector<32x32xf32>,
      } else {
      }
      %c0_i32_67 = arith.constant 0 : i32
      %82 = arith.cmpi sgt, %31, %c0_i32_67 : i32
      %83 = arith.extui %82 : i1 to i32
      %cst_68 = arith.constant 5.000000e+00 : f32
      %c0_i32_69 = arith.constant 0 : i32
      %84 = arith.cmpi ne, %83, %c0_i32_69 : i32
      scf.if %84 {
        %c0_70 = arith.constant 0 : index
        %c0_71 = arith.constant 0 : index
        %85 = vector.load %arg7[%c0_70, %c0_71] : memref<32x32xf32, #tpu.memory_space<vmem>>, vector<32x32xf32>
        %86 = tpu.transpose %85, [1, 0] : vector<32x32xf32> -> vector<32x32xf32>
        %87 = arith.mulf %85, %86 : vector<32x32xf32>
        %88 = vector.shape_cast %87 : vector<32x32xf32> to vector<1x32x32xf32>
        %cst_72 = arith.constant dense<0.000000e+00> : vector<1xf32>
        %89 = vector.multi_reduction <add>, %88, %cst_72 [1, 2] : vector<1x32x32xf32> to vector<1xf32>
        %90 = vector.shape_cast %89 : vector<1xf32> to vector<1x1x1xf32>
        %91 = vector.extract %90[0, 0, 0] : f32 from vector<1x1x1xf32>
        %92 = arith.mulf %cst_68, %91 : f32
        %93 = arith.addf %39, %92 : f32
        %c0_73 = arith.constant 0 : index
        %94 = memref.load %arg5[%c0_73] : memref<1xf32, #tpu.memory_space<smem>>
        memref.store %93, %arg5[%c0_73] : memref<1xf32, #tpu.memory_space<smem>>
      } else {
      }
    } else {
    }
    return
  }
  func.func @transform_0(%arg0: i32, %arg1: memref<1xi32, #tpu.memory_space<smem>>) -> (i32, i32) {
    %c0_i32 = arith.constant 0 : i32
    %c0_i32_0 = arith.constant 0 : i32
    return %arg0, %c0_i32 : i32, i32
  }
  func.func @transform_1(%arg0: i32, %arg1: memref<1xi32, #tpu.memory_space<smem>>) -> (i32, i32) {
    %c0_i32 = arith.constant 0 : i32
    %c0_i32_0 = arith.constant 0 : i32
    %c0_i32_1 = arith.constant 0 : i32
    return %c0_i32, %c0_i32_0 : i32, i32
  }
  func.func @transform_2(%arg0: i32, %arg1: memref<1xi32, #tpu.memory_space<smem>>) -> (i32, i32) {
    %c0_i32 = arith.constant 0 : i32
    %c0_i32_0 = arith.constant 0 : i32
    %c0_i32_1 = arith.constant 0 : i32
    return %c0_i32, %c0_i32_0 : i32, i32
  }
  func.func @transform_3(%arg0: i32, %arg1: memref<1xi32, #tpu.memory_space<smem>>) -> i32 {
    %c0_i32 = arith.constant 0 : i32
    %c0_i32_0 = arith.constant 0 : i32
    return %c0_i32 : i32
  }
}

</mosaic_0001>

<bundles_post_ra>
// kernel: tpu_custom_call.1
= control target key start
LH: loop header
LB: loop body
LE: loop exit
PB: predicated region body
PF: predicated region fallthrough
CT: control target
= control target key end

     0   :  { %s3436_s0 = inlined_call_operand.<no memory space> [shape: s32[1], index: 0, kind: input, shape index: {}]   ;;  %s3437_s1 = inlined_call_operand.vmem [shape: f32[128,32], index: 1, kind: input, shape index: {}]   ;;  %s3438_s2 = inlined_call_operand.vmem [shape: f32[32,32], index: 2, kind: input, shape index: {}]   ;;  %s3439_s3 = inlined_call_operand.vmem [shape: f32[32,32], index: 3, kind: input, shape index: {}]   ;;  %s3440_s4 = inlined_call_operand.hbm [shape: f32[1], index: 4, kind: output, shape index: {}]  }
   0x1   :  { %v26_v0 = vld [vmem:[%s3437_s1] sm:$0xff]  ;;  %v27_v1 = vld [vmem:[%s3437_s1 + $0x8] sm:$0xff]  ;;  %v28_v2 = vld [vmem:[%s3437_s1 + $0x10] sm:$0xff] }
   0x2   :  { %46 = vxpose.xlu0.b32.start [1/16] (narrow) %v26_v0, 32  ;;  %v29_v3 = vld [vmem:[%s3437_s1 + $0x18] sm:$0xff]  ;;  %v2716_v4 = vpack.c.bf16 %v27_v1, %v26_v0  ;;  %v30_v6 = vld [vmem:[%s3437_s1 + $0x20] sm:$0xff]  ;;  %v31_v7 = vld [vmem:[%s3437_s1 + $0x28] sm:$0xff] }
   0x3   :  { %v2720_v5 = vpack.c.bf16 %v29_v3, %v28_v2  ;;  %v2724_v8 = vpack.c.bf16 %v31_v7, %v30_v6 }
   0x4   :  { %2717 = vmatprep.subr.bf16.mxu0 %v2716_v4 }
   0x5   :  { %2719 = vmatpush3.bf16.msra.mxu0 %v2716_v4 }
   0x6   :  { %47 = vxpose.xlu0.b32.cont [2/16] (narrow) %v27_v1, 32 }
   0x7   :  { %10 = vsyncpa [#allocation7], 0  ;;  %2721 = vmatprep.subr.bf16.mxu0 %v2720_v5  ;;  %v32_v9 = vld [vmem:[%s3437_s1 + $0x30] sm:$0xff]  ;;  %v33_v10 = vld [vmem:[%s3437_s1 + $0x38] sm:$0xff]  ;;  %vm21_vm0 = vcmask 261120   ;;  %v2942_v15 = vmov 0.0   ;;  %v179_v29 = vlaneseq }
   0x8   :  { %v2728_v11 = vpack.c.bf16 %v33_v10, %v32_v9  ;;  %v34_v12 = vld [vmem:[%s3437_s1 + $0x40] sm:$0xff]  ;;  %v35_v13 = vld [vmem:[%s3437_s1 + $0x48] sm:$0xff]  ;;  %23 = vst.msk [vmem:[#allocation2 + $0x8] sm:$0xff] %vm21_vm0, %v2942_v15  ;;  %22 = vst.msk [vmem:[#allocation2] sm:$0xff] %vm21_vm0, %v2942_v15  ;;  %p2271_p0 = scmp.ne.s32.totalorder %s3436_s0, 0 }
   0x9   :  { %2723 = vmatpush3.bf16.msra.mxu0 %v2720_v5  ;;  %v2732_v14 = vpack.c.bf16 %v35_v13, %v34_v12  ;;  %24 = vst.msk [vmem:[#allocation2 + $0x10] sm:$0xff] %vm21_vm0, %v2942_v15  ;;  %25 = vst.msk [vmem:[#allocation2 + $0x18] sm:$0xff] %vm21_vm0, %v2942_v15  ;;  %v36_v16 = vld [vmem:[%s3437_s1 + $0x50] sm:$0xff]  ;;  %v37_v17 = vld [vmem:[%s3437_s1 + $0x58] sm:$0xff]  ;;  %v180_v30 = vshrl.u32 %v179_v29, 7  ;;  %v185_v32 = vand.u32 127, %v179_v29 }
   0xa   :  { %48 = vxpose.xlu0.b32.cont [3/16] (narrow) %v28_v2, 32  ;;  %2725 = vmatprep.subr.bf16.mxu0 %v2724_v8  ;;  %v2736_v18 = vpack.c.bf16 %v37_v17, %v36_v16  ;;  %v38_v19 = vld [vmem:[%s3437_s1 + $0x60] sm:$0xff]  ;;  %v39_v20 = vld [vmem:[%s3437_s1 + $0x68] sm:$0xff]  ;;  %v40_v22 = vld [vmem:[%s3437_s1 + $0x70] sm:$0xff] }
   0xb   :  { %v2740_v21 = vpack.c.bf16 %v39_v20, %v38_v19  ;;  %v41_v23 = vld [vmem:[%s3437_s1 + $0x78] sm:$0xff]  ;;  %v181_v31 = vadd.s32 8, %v180_v30  ;;  %vm186_vm1 = vcmp.eq.s32.totalorder %v180_v30, %v185_v32  ;;  %v3028_v33 = vld [vmem:[%s3438_s2] sm:$0xff]  ;;  %v3033_v34 = vld [vmem:[%s3438_s2 + $0x8] sm:$0xff]  ;;  %v182_v39 = vadd.s32 16, %v180_v30 }
   0xc   :  { %v2744_v24 = vpack.c.bf16 %v41_v23, %v40_v22  ;;  %v3036_v35 = vsel %vm186_vm1, 1.0, %v2942_v15  ;;  %v183_v40 = vadd.s32 24, %v180_v30  ;;  %v3054_v42 = vld [vmem:[%s3438_s2 + $0x10] sm:$0xff]  ;;  %v3059_v43 = vld [vmem:[%s3438_s2 + $0x18] sm:$0xff]  ;;  %v3077_v49 = vld [vmem:[%s3439_s3] sm:$0xff] }
   0xd   :  { %2727 = vmatpush3.bf16.msra.mxu0 %v2724_v8  ;;  %vm187_vm2 = vcmp.eq.s32.totalorder %v181_v31, %v185_v32  ;;  %v3043_v37 = vsub.f32 %v3036_v35, %v3028_v33  ;;  %vm188_vm3 = vcmp.eq.s32.totalorder %v182_v39, %v185_v32  ;;  %v3082_v50 = vld [vmem:[%s3439_s3 + $0x8] sm:$0xff]  ;;  %v3091_v61 = vld [vmem:[%s3439_s3 + $0x10] sm:$0xff]  ;;  %v3096_v62 = vld [vmem:[%s3439_s3 + $0x18] sm:$0xff]  ;;  %v325_v8 = vand.u32 2147483647, %v3033_v34 }
   0xe   :  { %49 = vxpose.xlu0.b32.cont [4/16] (narrow) %v29_v3, 32  ;;  %2729 = vmatprep.subr.bf16.mxu0 %v2728_v11  ;;  %v3039_v36 = vsel %vm187_vm2, 1.0, %v2942_v15  ;;  %vm189_vm4 = vcmp.eq.s32.totalorder %v183_v40, %v185_v32  ;;  %v3062_v44 = vsel %vm188_vm3, 1.0, %v2942_v15  ;;  %v2756_v51 = vpack.c.bf16 %v3082_v50, %v3077_v49 }
   0xf   :  { %v3047_v38 = vsub.f32 %v3039_v36, %v3033_v34  ;;  %v3065_v45 = vsel %vm189_vm4, 1.0, %v2942_v15  ;;  %v3069_v46 = vsub.f32 %v3062_v44, %v3054_v42  ;;  %v43_v52 = vld [vmem:[#allocation2 + $0x8] sm:$0xff]  ;;  %v42_v53 = vld [vmem:[#allocation2] sm:$0xff]  ;;  %v2760_v3 = vpack.c.bf16 %v3096_v62, %v3091_v61 }
  0x10   :  { %v201_v47 = vsub.f32 %v3065_v45, %v3059_v43  ;;  %v45_v58 = vld [vmem:[#allocation2 + $0x18] sm:$0xff]  ;;  %v44_v59 = vld [vmem:[#allocation2 + $0x10] sm:$0xff] }
  0x11   :  { %2731 = vmatpush3.bf16.msra.mxu0 %v2728_v11  ;;  %v2748_v41 = vpack.c.bf16 %v3047_v38, %v3043_v37 }
  0x12   :  { %50 = vxpose.xlu0.b32.cont [5/16] (narrow) %v30_v6, 32  ;;  %2733 = vmatprep.subr.bf16.mxu0 %v2732_v14  ;;  %v2752_v48 = vpack.c.bf16 %v201_v47, %v3069_v46 }
  0x13   :  { %2749 = vmatprep.subr.bf16.mxu1 %v2748_v41 }
  0x14   :  { %2751 = vmatpush3.bf16.msra.mxu1 %v2748_v41 }
  0x15   :  { %2735 = vmatpush3.bf16.msra.mxu0 %v2732_v14  ;;  %2753 = vmatprep.subr.bf16.mxu1 %v2752_v48 }
  0x16   :  { %51 = vxpose.xlu0.b32.cont [6/16] (narrow) %v31_v7, 32  ;;  %2737 = vmatprep.subr.bf16.mxu0 %v2736_v18  ;;  %v324_v7 = vand.u32 2147483647, %v3028_v33 }
  0x18   :  { %2755 = vmatpush3.bf16.msra.mxu1 %v2752_v48 }
  0x19   :  { %2739 = vmatpush3.bf16.msra.mxu0 %v2736_v18  ;;  %2757 = vmatprep.subr.bf16.mxu1 %v2756_v51 }
  0x1a   :  { %52 = vxpose.xlu0.b32.cont [7/16] (narrow) %v32_v9, 32  ;;  %2741 = vmatprep.subr.bf16.mxu0 %v2740_v21  ;;  %v328_v9 = vsel %vm21_vm0, %v324_v7, 0.0  ;;  %v637_v7 = vmul.f32 (!%p2271_p0), %v3062_v44, %v3091_v61 }
  0x1d   :  { %2743 = vmatpush3.bf16.msra.mxu0 %v2740_v21 }
  0x1e   :  { %53 = vxpose.xlu0.b32.cont [8/16] (narrow) %v33_v10, 32  ;;  %2745 = vmatprep.subr.bf16.mxu0 %v2744_v24  ;;  %v329_v10 = vsel %vm21_vm0, %v325_v8, 0.0 }
  0x1f   :  { %v330_v11 = vadd.f32 %v329_v10, %v328_v9 }
  0x21   :  { %2747 = vmatpush3.bf16.msra.mxu0 %v2744_v24  ;;  %v327_v24 = vand.u32 2147483647, %v3059_v43 }
  0x22   :  { %54 = vxpose.xlu0.b32.cont [9/16] (narrow) %v34_v12, 32 }
  0x23   :  { %v333_v33 = vsel %vm21_vm0, %v327_v24, 0.0 }
  0x26   :  { %55 = vxpose.xlu0.b32.cont [10/16] (narrow) %v35_v13, 32 }
  0x2a   :  { %56 = vxpose.xlu0.b32.cont [11/16] (narrow) %v36_v16, 32 }
  0x2e   :  { %57 = vxpose.xlu0.b32.cont [12/16] (narrow) %v37_v17, 32 }
  0x32   :  { %58 = vxpose.xlu0.b32.cont [13/16] (narrow) %v38_v19, 32  ;;  %v326_v19 = vand.u32 2147483647, %v3054_v42 }
  0x36   :  { %59 = vxpose.xlu0.b32.cont [14/16] (narrow) %v39_v20, 32 }
  0x3a   :  { %60 = vxpose.xlu0.b32.cont [15/16] (narrow) %v40_v22, 32 }
  0x3e   :  { %61 = vxpose.xlu0.b32.end [16/16] (narrow) %v41_v23, 32 }
  0x42   :  { %656 = vxpose.xlu0.b32.start [1/4] (short) (narrow) (!%p2271_p0), %v3077_v49, 32 }
  0x46   :  { %657 = vxpose.xlu0.b32.cont [2/4] (short) (narrow) (!%p2271_p0), %v3082_v50, 32 }
  0x4a   :  { %658 = vxpose.xlu0.b32.cont [3/4] (short) (narrow) (!%p2271_p0), %v3091_v61, 32 }
  0x4e   :  { %659 = vxpose.xlu0.b32.end [4/4] (short) (narrow) (!%p2271_p0), %v3096_v62, 32 }
  0x82   :  { %v62_v25 = vpop.trf.xlu0 }
  0x83   :  { %2500 = vmatprep.mubr.f32.mxu0 %v62_v25  ;;  %v331_v25 = vsel %vm21_vm0, %v326_v19, 0.0 }
  0x84   :  { %v332_v30 = vadd.f32 %v331_v25, %v330_v11  ;;  %v638_v11 = vmul.f32 (!%p2271_p0), %v3065_v45, %v3096_v62 }
  0x86   :  { %v63_v26 = vpop.trf.xlu0  ;;  %v334_v39 = vadd.f32 %v333_v33, %v332_v30 }
  0x87   :  { %2501 = vmatmul.mubr.f32.vlgmr.msra.gmra.mrb[0].mxu0 %v63_v26 }
  0x8a   :  { %v64_v27 = vpop.trf.xlu0 }
  0x8b   :  { %2503 = vmatprep.mubr.f32.mxu0 %v64_v27 }
  0x8e   :  { %v65_v28 = vpop.trf.xlu0 }
  0x8f   :  { %2504 = vmatmul.mubr.f32.gmra.mrb[2].mxu0 %v65_v28 }
 0x15a   :  { %v2502_v54 = vpop.f32.mrb[0].mxu0 }
 0x15b   :  { %v164_v55 = vadd.f32 %v2502_v54, %v43_v52  ;;  %v144_v56 = vpop.f32.mrb[1].mxu0 }
 0x15c   :  { %v163_v57 = vadd.f32 %v144_v56, %v42_v53 }
 0x15d   :  { %169 = vst.msk [vmem:[#allocation2 + $0x8] sm:$0xff] %vm21_vm0, %v164_v55 }
 0x15e   :  { %168 = vst.msk [vmem:[#allocation2] sm:$0xff] %vm21_vm0, %v163_v57 }
 0x162   :  { %v2505_v60 = vpop.f32.mrb[2].mxu0 }
 0x163   :  { %v166_v63 = vadd.f32 %v2505_v60, %v45_v58  ;;  %v154_v0 = vpop.f32.mrb[3].mxu0 }
 0x164   :  { %v165_v1 = vadd.f32 %v154_v0, %v44_v59  ;;  %v203_v4 = vld [vmem:[#allocation2 + $0x8] sm:$0xff] }
 0x165   :  { %171 = vst.msk [vmem:[#allocation2 + $0x18] sm:$0xff] %vm21_vm0, %v166_v63  ;;  %v202_v2 = vld [vmem:[#allocation2] sm:$0xff] }
 0x166   :  { %170 = vst.msk [vmem:[#allocation2 + $0x10] sm:$0xff] %vm21_vm0, %v165_v1  ;;  %2514 = vmatprep.mubr.msk.f32.mxu1 %vm21_vm0, %v202_v2 }
 0x167   :  { %2515 = vmatmul.mubr.msk.f32.vlgmr.msra.gmra.mrb[0].mxu1 %vm21_vm0, %v203_v4 }
 0x168   :  { %2759 = vmatpush3.bf16.msra.mxu1 %v2756_v51 }
 0x169   :  { %2761 = vmatprep.subr.bf16.mxu1 %v2760_v3 }
 0x16c   :  { %2763 = vmatpush3.bf16.msra.mxu1 %v2760_v3  ;;  %v205_v6 = vld [vmem:[#allocation2 + $0x18] sm:$0xff] }
 0x16d   :  { %v204_v5 = vld [vmem:[#allocation2 + $0x10] sm:$0xff]  ;;  %2765 = vmatprep.subr.bf16.mxu1 %v2756_v51 }
 0x16e   :  { %2517 = vmatprep.mubr.msk.f32.mxu1 %vm21_vm0, %v204_v5  ;;  %v635_v5 = vmul.f32 (!%p2271_p0), %v3036_v35, %v3077_v49 }
 0x16f   :  { %2518 = vmatmul.mubr.msk.f32.gmra.mrb[2].mxu1 %vm21_vm0, %v205_v6  ;;  %v636_v6 = vmul.f32 (!%p2271_p0), %v3039_v36, %v3082_v50 }
 0x170   :  { %2528 = vmatprep.mubr.msk.f32.mxu1 %vm21_vm0, %v3077_v49  ;;  %v639_v8 = vsel (!%p2271_p0), %vm21_vm0, %v635_v5, 0.0 }
 0x171   :  { %v640_v9 = vsel (!%p2271_p0), %vm21_vm0, %v636_v6, 0.0 }
 0x172   :  { %v641_v10 = vadd.f32 (!%p2271_p0), %v640_v9, %v639_v8 }
 0x173   :  { %2529 = vmatmul.mubr.msk.f32.vlgmr.msra.gmra.mrb[4].mxu1 %vm21_vm0, %v3082_v50 }
 0x174   :  { %2531 = vmatprep.mubr.msk.f32.mxu1 %vm21_vm0, %v3091_v61  ;;  %2767 = vmatpush3.bf16.msra.mxu1 %v2756_v51 }
 0x175   :  { %2769 = vmatprep.subr.bf16.mxu1 %v2760_v3 }
 0x177   :  { %2532 = vmatmul.mubr.msk.f32.gmra.mrb[6].mxu1 %vm21_vm0, %v3096_v62 }
 0x178   :  { %2771 = vmatpush3.bf16.msra.mxu1 %v2760_v3 }
 0x23a   :  { %v2516_v12 = vpop.f32.mrb[0].mxu1 }
 0x23b   :  { %v304_v13 = vmul.f32 %v2516_v12, %v3047_v38  ;;  %v284_v14 = vpop.f32.mrb[1].mxu1  ;;  %v642_v12 = vsel (!%p2271_p0), %vm21_vm0, %v637_v7, 0.0 }
 0x23c   :  { %v303_v15 = vmul.f32 %v284_v14, %v3043_v37  ;;  %v644_v14 = vsel (!%p2271_p0), %vm21_vm0, %v638_v11, 0.0 }
 0x23d   :  { %v308_v16 = vsel %vm21_vm0, %v304_v13, 0.0  ;;  %v643_v13 = vadd.f32 (!%p2271_p0), %v642_v12, %v641_v10 }
 0x23e   :  { %v307_v17 = vsel %vm21_vm0, %v303_v15, 0.0 }
 0x23f   :  { %v309_v18 = vadd.f32 %v308_v16, %v307_v17  ;;  %v645_v15 = vadd.f32 (!%p2271_p0), %v644_v14, %v643_v13  ;;  %v672_v17 = vpop.trf.xlu0 (!%p2271_p0) }
 0x241   :  { %646 = vadd.xlane.f32.xlu0 (!%p2271_p0), %v645_v15 }
 0x242   :  { %v2519_v20 = vpop.f32.mrb[2].mxu1 }
 0x243   :  { %v294_v21 = vpop.f32.mrb[3].mxu1  ;;  %v306_v22 = vmul.f32 %v2519_v20, %v201_v47 }
 0x244   :  { %v305_v23 = vmul.f32 %v294_v21, %v3069_v46  ;;  %v673_v21 = vpop.trf.xlu0 (!%p2271_p0) }
 0x245   :  { %v312_v32 = vsel %vm21_vm0, %v306_v22, 0.0  ;;  %v689_v24 = vmul.f32 (!%p2271_p0), %v673_v21, %v3082_v50 }
 0x246   :  { %v310_v26 = vsel %vm21_vm0, %v305_v23, 0.0  ;;  %v3127_v27 = vpop.f32.mrb[4].mxu1 }
 0x247   :  { %v3129_v28 = vpop.f32.mrb[5].mxu1  ;;  %v311_v29 = vadd.f32 %v310_v26, %v309_v18  ;;  %v688_v18 = vmul.f32 (!%p2271_p0), %v672_v17, %v3077_v49  ;;  %v711_v25 = vmul.f32 (!%p2271_p0), %v3127_v27, %v673_v21  ;;  %v693_v26 = vsel (!%p2271_p0), %vm21_vm0, %v689_v24, 0.0 }
 0x248   :  { %v2772_v31 = vpack.c.bf16 %v3127_v27, %v3129_v28  ;;  %2542 = vmatprep.mubr.msk.f32.mxu1 %vm21_vm0, %v3129_v28  ;;  %v710_v19 = vmul.f32 (!%p2271_p0), %v672_v17, %v3129_v28  ;;  %v674_v33 = vpop.trf.xlu0 (!%p2271_p0) }
 0x249   :  { %2543 = vmatmul.mubr.msk.f32.vlgmr.msra.gmra.mrb[8].mxu1 %vm21_vm0, %v3127_v27  ;;  %v313_v34 = vadd.f32 %v312_v32, %v311_v29  ;;  %v692_v22 = vsel (!%p2271_p0), %vm21_vm0, %v688_v18, 0.0  ;;  %v715_v29 = vsel (!%p2271_p0), %vm21_vm0, %v711_v25, 0.0 }
 0x24a   :  { %v3139_v37 = vpop.f32.mrb[6].mxu1  ;;  %2773 = vmatprep.subr.bf16.mxu1 %v2772_v31  ;;  %v714_v23 = vsel (!%p2271_p0), %vm21_vm0, %v710_v19, 0.0  ;;  %v694_v30 = vadd.f32 (!%p2271_p0), %v693_v26, %v692_v22 }
 0x24b   :  { %v3141_v38 = vpop.f32.mrb[7].mxu1  ;;  %2775 = vmatpush3.bf16.msra.mxu1 %v2772_v31  ;;  %314 = vadd.xlane.f32.xlu1 %v313_v34  ;;  %v716_v31 = vadd.f32 (!%p2271_p0), %v715_v29, %v714_v23 }
 0x24c   :  { %v2776_v40 = vpack.c.bf16 %v3139_v37, %v3141_v38  ;;  %2545 = vmatprep.mubr.msk.f32.mxu1 %vm21_vm0, %v3141_v38 }
 0x24d   :  { %2546 = vmatmul.mubr.msk.f32.gmra.mrb[10].mxu1 %vm21_vm0, %v3139_v37 }
 0x24e   :  { %2777 = vmatprep.subr.bf16.mxu1 %v2776_v40  ;;  %2556 = vmatprep.mubr.msk.f32.mxu1 %vm21_vm0, %v3129_v28 }
 0x24f   :  { %2779 = vmatpush3.bf16.msra.mxu1 %v2776_v40  ;;  %335 = vadd.xlane.f32.xlu1 %v334_v39  ;;  %v690_v39 = vmul.f32 (!%p2271_p0), %v674_v33, %v3091_v61  ;;  %v712_v40 = vmul.f32 (!%p2271_p0), %v674_v33, %v3141_v38 }
 0x252   :  { %2557 = vmatmul.mubr.msk.f32.vlgmr.msra.gmra.mrb[12].mxu1 %vm21_vm0, %v3127_v27 }
 0x253   :  { %2559 = vmatprep.mubr.msk.f32.mxu1 %vm21_vm0, %v3141_v38 }
 0x256   :  { %2560 = vmatmul.mubr.msk.f32.gmra.mrb[14].mxu1 %vm21_vm0, %v3139_v37 }
 0x282   :  { %732 = vxpose.xlu1.b32.start [1/4] (short) (narrow) (!%p2271_p0), %v3129_v28, 32 }
 0x286   :  { %733 = vxpose.xlu1.b32.cont [2/4] (short) (narrow) (!%p2271_p0), %v3127_v27, 32 }
 0x28a   :  { %734 = vxpose.xlu1.b32.cont [3/4] (short) (narrow) (!%p2271_p0), %v3141_v38, 32 }
 0x28e   :  { %735 = vxpose.xlu1.b32.end [4/4] (short) (narrow) (!%p2271_p0), %v3139_v37, 32 }
 0x2d8   :  { %v315_v41 = vpop.xlane.xlu1 %314 }
 0x2d9   :  { %v316_v42 = vrot.slane %v315_v41, 4 }
 0x2db   :  { %v317_v43 = vadd.f32 %v316_v42, %v315_v41 }
 0x2dc   :  { %v336_v46 = vpop.xlane.xlu1 %335 }
 0x2dd   :  { %v318_v47 = vrot.slane %v317_v43, 2  ;;  %v337_v48 = vrot.slane %v336_v46, 4 }
 0x2df   :  { %v338_v51 = vadd.f32 %v337_v48, %v336_v46  ;;  %v319_v52 = vadd.f32 %v318_v47, %v317_v43  ;;  %v695_v43 = vsel (!%p2271_p0), %vm21_vm0, %v690_v39, 0.0  ;;  %v717_v46 = vsel (!%p2271_p0), %vm21_vm0, %v712_v40, 0.0 }
 0x2e0   :  { %v696_v48 = vadd.f32 (!%p2271_p0), %v695_v43, %v694_v30 }
 0x2e1   :  { %v339_v53 = vrot.slane %v338_v51, 2  ;;  %v320_v54 = vrot.slane %v319_v52, 1 }
 0x2e3   :  { %v340_v55 = vadd.f32 %v339_v53, %v338_v51  ;;  %v321_v56 = vadd.f32 %v320_v54, %v319_v52  ;;  %v718_v51 = vadd.f32 (!%p2271_p0), %v717_v46, %v716_v31  ;;  %v675_v53 = vpop.trf.xlu0 (!%p2271_p0) }
 0x2e5   :  { %2904 = vpush %v321_v56  ;;  %v341_v57 = vrot.slane %v340_v55, 1  ;;  %v691_v56 = vmul.f32 (!%p2271_p0), %v675_v53, %v3096_v62 }
 0x2e7   :  { %v342_v58 = vadd.f32 %v341_v57, %v340_v55  ;;  %v713_v57 = vmul.f32 (!%p2271_p0), %v3139_v37, %v675_v53  ;;  %v697_v8 = vsel (!%p2271_p0), %vm21_vm0, %v691_v56, 0.0 }
 0x2e8   :  { %v698_v12 = vadd.f32 (!%p2271_p0), %v697_v8, %v696_v48 }
 0x2e9   :  { %2906 = vpush %v342_v58  ;;  %v719_v9 = vsel (!%p2271_p0), %vm21_vm0, %v713_v57, 0.0 }
 0x2ea   :  { %v720_v13 = vadd.f32 (!%p2271_p0), %v719_v9, %v718_v51 }
 0x2ec   :  { %721 = vadd.xlane.f32.xlu0 (!%p2271_p0), %v720_v13 }
 0x302   :  { %v748_v16 = vpop.trf.xlu1 (!%p2271_p0) }
 0x303   :  { %v764_v41 = vmul.f32 (!%p2271_p0), %v748_v16, %v3129_v28 }
 0x305   :  { %v768_v58 = vsel (!%p2271_p0), %vm21_vm0, %v764_v41, 0.0 }
 0x306   :  { %v749_v20 = vpop.trf.xlu1 (!%p2271_p0) }
 0x307   :  { %v765_v34 = vmul.f32 (!%p2271_p0), %v3127_v27, %v749_v20 }
 0x309   :  { %v769_v54 = vsel (!%p2271_p0), %vm21_vm0, %v765_v34, 0.0 }
 0x30a   :  { %v750_v32 = vpop.trf.xlu1 (!%p2271_p0)  ;;  %v770_v10 = vadd.f32 (!%p2271_p0), %v769_v54, %v768_v58 }
 0x30b   :  { %v766_v42 = vmul.f32 (!%p2271_p0), %v750_v32, %v3141_v38 }
 0x30d   :  { %v771_v6 = vsel (!%p2271_p0), %vm21_vm0, %v766_v42, 0.0 }
 0x30e   :  { %v751_v52 = vpop.trf.xlu1 (!%p2271_p0)  ;;  %v772_v18 = vadd.f32 (!%p2271_p0), %v771_v6, %v770_v10 }
 0x30f   :  { %v767_v55 = vmul.f32 (!%p2271_p0), %v3139_v37, %v751_v52 }
 0x311   :  { %v773_v15 = vsel (!%p2271_p0), %vm21_vm0, %v767_v55, 0.0 }
 0x312   :  { %v774_v22 = vadd.f32 (!%p2271_p0), %v773_v15, %v772_v18 }
 0x316   :  { %s2905_s3 = spop %2904 }
 0x317   :  { %s323_s9 = smul.f32 16.0, %s2905_s3 }
 0x31a   :  { %s2907_s10 = spop %2906 }
 0x31b   :  { %s628_s11 = smul.f32 0.02, %s2907_s10 }
 0x31c   :  { %v3157_v59 = vpop.f32.mrb[8].mxu1 }
 0x31d   :  { %s3159_s12 = sadd.f32 %s628_s11, %s323_s9  ;;  %v3161_v60 = vpop.f32.mrb[9].mxu1  ;;  %v787_v47 = vmul.f32 (!%p2271_p0), %v3157_v59, %v749_v20 }
 0x31e   :  { %808 = vxpose.xlu1.b32.start [1/4] (short) (narrow) (!%p2271_p0), %v3161_v60, 32  ;;  %v786_v5 = vmul.f32 (!%p2271_p0), %v748_v16, %v3161_v60 }
 0x31f   :  { %s2270_s13 = sadd.f32 -160.0, %s3159_s12  ;;  %v791_v14 = vsel (!%p2271_p0), %vm21_vm0, %v787_v47, 0.0 }
 0x320   :  { %v3164_v63 = vpop.f32.mrb[10].mxu1  ;;  %v790_v16 = vsel (!%p2271_p0), %vm21_vm0, %v786_v5, 0.0 }
 0x321   :  { %v3166_v0 = vpop.f32.mrb[11].mxu1  ;;  %v789_v17 = vmul.f32 (!%p2271_p0), %v3164_v63, %v751_v52  ;;  %v792_v20 = vadd.f32 (!%p2271_p0), %v791_v14, %v790_v16 }
 0x322   :  { %809 = vxpose.xlu1.b32.cont [2/4] (short) (narrow) (!%p2271_p0), %v3157_v59, 32  ;;  %v788_v7 = vmul.f32 (!%p2271_p0), %v750_v32, %v3166_v0 }
 0x323   :  { %v795_v23 = vsel (!%p2271_p0), %vm21_vm0, %v789_v17, 0.0 }
 0x324   :  { %634 = sbr.rel (%p2271_p0) target bundleno = 1173 (0x495), region = 25  ;;  %v793_v19 = vsel (!%p2271_p0), %vm21_vm0, %v788_v7, 0.0 }
 0x325   :  { %v3168_v1 = vpop.f32.mrb[12].mxu1  ;;  %v794_v25 = vadd.f32 (!%p2271_p0), %v793_v19, %v792_v20  ;;  %v647_v20 = vpop.xlane.xlu0 (!%p2271_p0), %646 }
 0x326   :  { %v3170_v2 = vpop.f32.mrb[13].mxu1  ;;  %810 = vxpose.xlu1.b32.cont [3/4] (short) (narrow) (!%p2271_p0), %v3166_v0, 32 }
 0x327   :  { %v796_v30 = vadd.f32 (!%p2271_p0), %v795_v23, %v794_v25 }
 0x329   :  { %v3172_v3 = vpop.f32.mrb[14].mxu1 }
 0x32a   :  { %v3174_v4 = vpop.f32.mrb[15].mxu1  ;;  %811 = vxpose.xlu1.b32.end [4/4] (short) (narrow) (!%p2271_p0), %v3164_v63, 32 }
 0x32e   :  { %884 = vxpose.xlu1.b32.start [1/4] (short) (narrow) %v3170_v2, 32 }
 0x332   :  { %885 = vxpose.xlu1.b32.cont [2/4] (short) (narrow) %v3168_v1, 32 }
 0x336   :  { %886 = vxpose.xlu1.b32.cont [3/4] (short) (narrow) %v3174_v4, 32 }
 0x33a   :  { %887 = vxpose.xlu1.b32.end [4/4] (short) (narrow) %v3172_v3, 32 }
 0x361   :  { %699 = vadd.xlane.f32.xlu1 %v698_v12 }
 0x365   :  { %775 = vadd.xlane.f32.xlu1 %v774_v22 }
 0x369   :  { %797 = vadd.xlane.f32.xlu1 %v796_v30 }
 0x39e   :  { %v824_v11 = vpop.trf.xlu1 }
 0x39f   :  { %v840_v26 = vmul.f32 %v824_v11, %v3161_v60  ;;  %v862_v39 = vmul.f32 %v824_v11, %v3170_v2 }
 0x3a1   :  { %v844_v34 = vsel %vm21_vm0, %v840_v26, 0.0  ;;  %v866_v52 = vsel %vm21_vm0, %v862_v39, 0.0  ;;  %v722_v26 = vpop.xlane.xlu0 %721 }
 0x3a2   :  { %v825_v21 = vpop.trf.xlu1  ;;  %v723_v30 = vrot.slane %v722_v26, 4 }
 0x3a3   :  { %v841_v24 = vmul.f32 %v3157_v59, %v825_v21  ;;  %v863_v32 = vmul.f32 %v3168_v1, %v825_v21 }
 0x3a5   :  { %v845_v31 = vsel %vm21_vm0, %v841_v24, 0.0  ;;  %v867_v46 = vsel %vm21_vm0, %v863_v32, 0.0  ;;  %v724_v32 = vadd.f32 %v723_v30, %v722_v26 }
 0x3a6   :  { %v826_v29 = vpop.trf.xlu1  ;;  %v846_v42 = vadd.f32 %v845_v31, %v844_v34  ;;  %v868_v55 = vadd.f32 %v867_v46, %v866_v52 }
 0x3a7   :  { %v842_v33 = vmul.f32 %v826_v29, %v3166_v0  ;;  %v864_v41 = vmul.f32 %v826_v29, %v3174_v4  ;;  %v725_v34 = vrot.slane %v724_v32, 2 }
 0x3a9   :  { %v847_v40 = vsel %vm21_vm0, %v842_v33, 0.0  ;;  %v869_v53 = vsel %vm21_vm0, %v864_v41, 0.0 }
 0x3aa   :  { %v827_v43 = vpop.trf.xlu1  ;;  %v848_v51 = vadd.f32 %v847_v40, %v846_v42  ;;  %v870_v5 = vadd.f32 %v869_v53, %v868_v55  ;;  %v726_v40 = vadd.f32 %v725_v34, %v724_v32 }
 0x3ab   :  { %v843_v47 = vmul.f32 %v3164_v63, %v827_v43  ;;  %v865_v48 = vmul.f32 %v3172_v3, %v827_v43 }
 0x3ad   :  { %v849_v54 = vsel %vm21_vm0, %v843_v47, 0.0  ;;  %v871_v58 = vsel %vm21_vm0, %v865_v48, 0.0 }
 0x3ae   :  { %v900_v56 = vpop.trf.xlu1  ;;  %v850_v57 = vadd.f32 %v849_v54, %v848_v51  ;;  %v872_v7 = vadd.f32 %v871_v58, %v870_v5  ;;  %v727_v51 = vrot.slane %v726_v40, 1 }
 0x3af   :  { %v916_v9 = vmul.f32 %v900_v56, %v3170_v2  ;;  %v648_v2 = vrot.slane %v647_v20, 4 }
 0x3b0   :  { %851 = vadd.xlane.f32.xlu1 %v850_v57  ;;  %v728_v54 = vadd.f32 %v727_v51, %v726_v40 }
 0x3b1   :  { %v920_v13 = vsel %vm21_vm0, %v916_v9, 0.0  ;;  %v649_v21 = vadd.f32 %v648_v2, %v647_v20 }
 0x3b2   :  { %v901_v6 = vpop.trf.xlu1 }
 0x3b3   :  { %v917_v8 = vmul.f32 %v3168_v1, %v901_v6  ;;  %v650_v22 = vrot.slane %v649_v21, 2 }
 0x3b4   :  { %873 = vadd.xlane.f32.xlu1 %v872_v7 }
 0x3b5   :  { %v921_v11 = vsel %vm21_vm0, %v917_v8, 0.0  ;;  %v651_v23 = vadd.f32 %v650_v22, %v649_v21 }
 0x3b6   :  { %v902_v10 = vpop.trf.xlu1  ;;  %v922_v15 = vadd.f32 %v921_v11, %v920_v13 }
 0x3b7   :  { %v918_v12 = vmul.f32 %v902_v10, %v3174_v4  ;;  %v652_v24 = vrot.slane %v651_v23, 1 }
 0x3b9   :  { %v923_v14 = vsel %vm21_vm0, %v918_v12, 0.0  ;;  %v653_v4 = vadd.f32 %v652_v24, %v651_v23 }
 0x3ba   :  { %v903_v17 = vpop.trf.xlu1  ;;  %v924_v16 = vadd.f32 %v923_v14, %v922_v15 }
 0x3bb   :  { %v919_v18 = vmul.f32 %v3172_v3, %v903_v17  ;;  %2908 = vpush %v653_v4 }
 0x3bd   :  { %v925_v19 = vsel %vm21_vm0, %v919_v18, 0.0 }
 0x3be   :  { %v926_v1 = vadd.f32 %v925_v19, %v924_v16 }
 0x3c0   :  { %927 = vadd.xlane.f32.xlu1 %v926_v1 }
 0x3ec   :  { %s2909_s16 = spop %2908 }
 0x3ed   :  { %s655_s18 = sadd.f32 32.0, %s2909_s16 }
 0x3ee   :  { %v700_v25 = vpop.xlane.xlu1 %699 }
 0x3ef   :  { %v701_v29 = vrot.slane %v700_v25, 4 }
 0x3f1   :  { %v702_v31 = vadd.f32 %v701_v29, %v700_v25 }
 0x3f2   :  { %v776_v3 = vpop.xlane.xlu1 %775 }
 0x3f3   :  { %v703_v33 = vrot.slane %v702_v31, 2  ;;  %v777_v39 = vrot.slane %v776_v3, 4 }
 0x3f5   :  { %v778_v41 = vadd.f32 %v777_v39, %v776_v3  ;;  %v704_v42 = vadd.f32 %v703_v33, %v702_v31 }
 0x3f6   :  { %v798_v43 = vpop.xlane.xlu1 %797 }
 0x3f7   :  { %v779_v46 = vrot.slane %v778_v41, 2  ;;  %v799_v47 = vrot.slane %v798_v43, 4  ;;  %v705_v48 = vrot.slane %v704_v42, 1 }
 0x3f9   :  { %v800_v52 = vadd.f32 %v799_v47, %v798_v43  ;;  %v706_v53 = vadd.f32 %v705_v48, %v704_v42  ;;  %v780_v55 = vadd.f32 %v779_v46, %v778_v41 }
 0x3fb   :  { %v801_v56 = vrot.slane %v800_v52, 2  ;;  %2910 = vpush %v706_v53  ;;  %v781_v57 = vrot.slane %v780_v55, 1 }
 0x3fc   :  { %2912 = vpush %v728_v54 }
 0x3fd   :  { %v782_v58 = vadd.f32 %v781_v57, %v780_v55  ;;  %v802_v5 = vadd.f32 %v801_v56, %v800_v52 }
 0x3ff   :  { %2914 = vpush %v782_v58  ;;  %v803_v8 = vrot.slane %v802_v5, 1 }
 0x401   :  { %v804_v10 = vadd.f32 %v803_v8, %v802_v5 }
 0x403   :  { %2916 = vpush %v804_v10 }
 0x42c   :  { %s2911_s17 = spop %2910 }
 0x42d   :  { %s708_s19 = smul.f32 0.5, %s2911_s17  ;;  %s2913_s20 = spop %2912 }
 0x42e   :  { %s730_s22 = smul.f32 0.16666667, %s2913_s20 }
 0x42f   :  { %s709_s1 = sadd.f32 %s708_s19, %s655_s18 }
 0x430   :  { %s2915_s21 = spop %2914 }
 0x431   :  { %s731_s24 = sadd.f32 %s730_s22, %s709_s1  ;;  %s784_s25 = smul.f32 0.041666668, %s2915_s21 }
 0x433   :  { %s785_s28 = sadd.f32 %s784_s25, %s731_s24 }
 0x434   :  { %s2917_s23 = spop %2916 }
 0x435   :  { %s806_s27 = smul.f32 0.008333334, %s2917_s23 }
 0x437   :  { %s807_s30 = sadd.f32 %s806_s27, %s785_s28 }
 0x43d   :  { %v852_v6 = vpop.xlane.xlu1 %851 }
 0x43e   :  { %v853_v7 = vrot.slane %v852_v6, 4 }
 0x440   :  { %v854_v9 = vadd.f32 %v853_v7, %v852_v6 }
 0x441   :  { %v874_v11 = vpop.xlane.xlu1 %873 }
 0x442   :  { %v855_v12 = vrot.slane %v854_v9, 2  ;;  %v875_v13 = vrot.slane %v874_v11, 4 }
 0x444   :  { %v876_v14 = vadd.f32 %v875_v13, %v874_v11  ;;  %v856_v15 = vadd.f32 %v855_v12, %v854_v9 }
 0x446   :  { %v877_v17 = vrot.slane %v876_v14, 2  ;;  %v857_v18 = vrot.slane %v856_v15, 1 }
 0x448   :  { %v858_v16 = vadd.f32 %v857_v18, %v856_v15  ;;  %v878_v19 = vadd.f32 %v877_v17, %v876_v14 }
 0x44a   :  { %2918 = vpush %v858_v16  ;;  %v879_v1 = vrot.slane %v878_v19, 1 }
 0x44c   :  { %v880_v20 = vadd.f32 %v879_v1, %v878_v19 }
 0x44d   :  { %v928_v2 = vpop.xlane.xlu1 %927 }
 0x44e   :  { %v929_v21 = vrot.slane %v928_v2, 4  ;;  %2920 = vpush %v880_v20 }
 0x450   :  { %v930_v22 = vadd.f32 %v929_v21, %v928_v2 }
 0x452   :  { %v931_v23 = vrot.slane %v930_v22, 2 }
 0x454   :  { %v932_v24 = vadd.f32 %v931_v23, %v930_v22 }
 0x456   :  { %v933_v4 = vrot.slane %v932_v24, 1 }
 0x458   :  { %v934_v25 = vadd.f32 %v933_v4, %v932_v24 }
 0x45a   :  { %2922 = vpush %v934_v25 }
 0x47b   :  { %s2919_s26 = spop %2918 }
 0x47c   :  { %s860_s29 = smul.f32 0.0013888889, %s2919_s26 }
 0x47e   :  { %s861_s6 = sadd.f32 %s860_s29, %s807_s30 }
 0x47f   :  { %s2921_s2 = spop %2920 }
 0x480   :  { %s882_s5 = smul.f32 0.0001984127, %s2921_s2 }
 0x482   :  { %s883_s8 = sadd.f32 %s882_s5, %s861_s6 }
 0x48b   :  { %s2923_s7 = spop %2922 }
 0x48c   :  { %s936_s3 = smul.f32 2.4801588e-05, %s2923_s7 }
 0x48e   :  { %s937_s9 = sadd.f32 %s936_s3, %s883_s8 }
 0x490   :  { %s938_s10 = smul.f32 5.0, %s937_s9 }
 0x492   :  { %s939_s11 = sadd.f32 %s2270_s13, %s938_s10 }
 0x494   :  { %941 = sst [smem:[#allocation6]] %s939_s11 }
 0x495 PF:  { %p2272_p1 = scmp.le.s32.totalorder %s3436_s0, 0 }
 0x496   :  { %v978_v26 = vmul.f32 (!%p2272_p1), 0.0013888889, %v3036_v35  ;;  %v979_v29 = vmul.f32 (!%p2272_p1), 0.0013888889, %v3039_v36  ;;  %v982_v30 = vmul.f32 (!%p2272_p1), 0.0001984127, %v3077_v49  ;;  %2570 = vmatprep.mubr.msk.f32.mxu0 (!%p2272_p1), %vm21_vm0, %v3161_v60  ;;  %2584 = vmatprep.mubr.msk.f32.mxu1 (!%p2272_p1), %vm21_vm0, %v3161_v60 }
 0x497   :  { %945 = sbr.rel (%p2272_p1) target bundleno = 1636 (0x664), region = 29  ;;  %v983_v31 = vmul.f32 (!%p2272_p1), 0.0001984127, %v3082_v50  ;;  %v990_v32 = vmul.f32 (!%p2272_p1), 2.4801588e-05, %v3129_v28 }
 0x498   :  { %v991_v3 = vmul.f32 (!%p2272_p1), 2.4801588e-05, %v3127_v27  ;;  %v986_v33 = vadd.f32 (!%p2272_p1), %v982_v30, %v978_v26  ;;  %v980_v34 = vmul.f32 (!%p2272_p1), 0.0013888889, %v3062_v44  ;;  %v981_v39 = vmul.f32 (!%p2272_p1), 0.0013888889, %v3065_v45 }
 0x499   :  { %v984_v40 = vmul.f32 (!%p2272_p1), 0.0001984127, %v3091_v61  ;;  %v987_v41 = vadd.f32 (!%p2272_p1), %v983_v31, %v979_v29  ;;  %v985_v42 = vmul.f32 (!%p2272_p1), 0.0001984127, %v3096_v62  ;;  %v992_v43 = vmul.f32 (!%p2272_p1), 2.4801588e-05, %v3141_v38 }
 0x49a   :  { %v993_v60 = vmul.f32 (!%p2272_p1), 2.4801588e-05, %v3139_v37  ;;  %v994_v46 = vadd.f32 (!%p2272_p1), %v990_v32, %v986_v33  ;;  %v959_v56 = vmul.f32 (!%p2272_p1), 0.16666667, %v3039_v36  ;;  %v963_v57 = vmul.f32 (!%p2272_p1), 0.041666668, %v3082_v50 }
 0x49b   :  { %v988_v47 = vadd.f32 (!%p2272_p1), %v984_v40, %v980_v34  ;;  %v995_v48 = vadd.f32 (!%p2272_p1), %v991_v3, %v987_v41  ;;  %v989_v51 = vadd.f32 (!%p2272_p1), %v985_v42, %v981_v39  ;;  %v958_v58 = vmul.f32 (!%p2272_p1), 0.16666667, %v3036_v35 }
 0x49c   :  { %v962_v5 = vmul.f32 (!%p2272_p1), 0.041666668, %v3077_v49  ;;  %v967_v6 = vadd.f32 (!%p2272_p1), %v963_v57, %v959_v56  ;;  %v971_v7 = vmul.f32 (!%p2272_p1), 0.008333334, %v3127_v27  ;;  %v961_v8 = vmul.f32 (!%p2272_p1), 0.16666667, %v3065_v45 }
 0x49d   :  { %v996_v52 = vadd.f32 (!%p2272_p1), %v992_v43, %v988_v47  ;;  %v2780_v53 = vpack.c.bf16 (!%p2272_p1), %v995_v48, %v994_v46  ;;  %v997_v54 = vadd.f32 (!%p2272_p1), %v993_v60, %v989_v51  ;;  %v965_v9 = vmul.f32 (!%p2272_p1), 0.041666668, %v3096_v62 }
 0x49e   :  { %v966_v10 = vadd.f32 %v962_v5, %v958_v58  ;;  %v970_v11 = vmul.f32 0.008333334, %v3129_v28  ;;  %v960_v12 = vmul.f32 0.16666667, %v3062_v44  ;;  %v964_v13 = vmul.f32 0.041666668, %v3091_v61 }
 0x49f   :  { %2781 = vmatprep.subr.bf16.mxu0 %v2780_v53  ;;  %v2784_v55 = vpack.c.bf16 %v997_v54, %v996_v52  ;;  %v975_v14 = vadd.f32 %v971_v7, %v967_v6  ;;  %v969_v15 = vadd.f32 %v965_v9, %v961_v8  ;;  %v973_v17 = vmul.f32 0.008333334, %v3139_v37 }
 0x4a0   :  { %2783 = vmatpush3.bf16.msra.mxu0 %v2780_v53  ;;  %v974_v18 = vadd.f32 %v970_v11, %v966_v10  ;;  %v968_v16 = vadd.f32 %v964_v13, %v960_v12  ;;  %v972_v19 = vmul.f32 0.008333334, %v3141_v38  ;;  %v947_v31 = vadd.f32 %v3039_v36, %v3082_v50 }
 0x4a1   :  { %2785 = vmatprep.subr.bf16.mxu0 %v2784_v55  ;;  %v977_v21 = vadd.f32 %v973_v17, %v969_v15  ;;  %v951_v32 = vmul.f32 0.5, %v3127_v27  ;;  %v946_v3 = vadd.f32 %v3036_v35, %v3077_v49  ;;  %v950_v33 = vmul.f32 0.5, %v3129_v28 }
 0x4a2   :  { %v976_v23 = vadd.f32 %v972_v19, %v968_v16  ;;  %v953_v39 = vmul.f32 0.5, %v3139_v37  ;;  %v952_v40 = vmul.f32 0.5, %v3141_v38 }
 0x4a3   :  { %v955_v34 = vadd.f32 %v951_v32, %v947_v31 }
 0x4a4   :  { %2787 = vmatpush3.bf16.msra.mxu0 %v2784_v55 }
 0x4a7   :  { %2571 = vmatmul.mubr.msk.f32.vlgmr.msra.gmra.mrb[0].mxu0 %vm21_vm0, %v3157_v59 }
 0x4a8   :  { %2573 = vmatprep.mubr.msk.f32.mxu0 %vm21_vm0, %v3166_v0 }
 0x4ab   :  { %2574 = vmatmul.mubr.msk.f32.gmra.mrb[2].mxu0 %vm21_vm0, %v3164_v63 }
 0x57a   :  { %v2572_v1 = vpop.f32.mrb[0].mxu0 }
 0x57b   :  { %v1096_v20 = vadd.f32 %v2572_v1, %v975_v14  ;;  %v1076_v2 = vpop.f32.mrb[1].mxu0 }
 0x57c   :  { %v1095_v22 = vadd.f32 %v1076_v2, %v974_v18 }
 0x57e   :  { %v2575_v24 = vpop.f32.mrb[2].mxu0  ;;  %v2788_v4 = vpack.c.bf16 %v1096_v20, %v1095_v22 }
 0x57f   :  { %v1098_v25 = vadd.f32 %v2575_v24, %v977_v21  ;;  %v1086_v26 = vpop.f32.mrb[3].mxu0 }
 0x580   :  { %v1097_v29 = vadd.f32 %v1086_v26, %v976_v23  ;;  %2789 = vmatprep.subr.bf16.mxu1 %v2788_v4 }
 0x581   :  { %2791 = vmatpush3.bf16.msra.mxu1 %v2788_v4 }
 0x582   :  { %v2792_v30 = vpack.c.bf16 %v1098_v25, %v1097_v29 }
 0x584   :  { %2793 = vmatprep.subr.bf16.mxu1 %v2792_v30 }
 0x585   :  { %2795 = vmatpush3.bf16.msra.mxu1 %v2792_v30 }
 0x588   :  { %2585 = vmatmul.mubr.msk.f32.vlgmr.msra.gmra.mrb[0].mxu1 %vm21_vm0, %v3157_v59  ;;  %v949_v59 = vadd.f32 %v3065_v45, %v3096_v62 }
 0x589   :  { %2587 = vmatprep.mubr.msk.f32.mxu1 %vm21_vm0, %v3166_v0  ;;  %v954_v0 = vadd.f32 %v950_v33, %v946_v3 }
 0x58a   :  { %v957_v41 = vadd.f32 %v953_v39, %v949_v59 }
 0x58c   :  { %2588 = vmatmul.mubr.msk.f32.gmra.mrb[2].mxu1 %vm21_vm0, %v3164_v63  ;;  %v948_v63 = vadd.f32 %v3062_v44, %v3091_v61 }
 0x58e   :  { %v956_v35 = vadd.f32 %v952_v40, %v948_v63 }
 0x65b   :  { %v2586_v36 = vpop.f32.mrb[0].mxu1 }
 0x65c   :  { %v1185_v50 = vadd.f32 %v2586_v36, %v955_v34  ;;  %v1165_v27 = vpop.f32.mrb[1].mxu1 }
 0x65d   :  { %v1184_v42 = vadd.f32 %v1165_v27, %v954_v0 }
 0x65e   :  { %1189 = vst.msk [vmem:[#allocation3 + $0x8] sm:$0xff] %vm21_vm0, %v1185_v50 }
 0x65f   :  { %1188 = vst.msk [vmem:[#allocation3] sm:$0xff] %vm21_vm0, %v1184_v42  ;;  %v2589_v49 = vpop.f32.mrb[2].mxu1 }
 0x660   :  { %v1187_v45 = vadd.f32 %v2589_v49, %v957_v41  ;;  %v1175_v62 = vpop.f32.mrb[3].mxu1 }
 0x661   :  { %v1186_v28 = vadd.f32 %v1175_v62, %v956_v35 }
 0x662   :  { %1191 = vst.msk [vmem:[#allocation3 + $0x18] sm:$0xff] %vm21_vm0, %v1187_v45 }
 0x663   :  { %1190 = vst.msk [vmem:[#allocation3 + $0x10] sm:$0xff] %vm21_vm0, %v1186_v28 }
 0x664 PF:  { %s3331_s20 = sadd.s32 4294967295, %s3436_s0 }
 0x665   :  { %p2282_p2 = scmp.le.s32.totalorder %s3331_s20, 0 }
 0x666   :  { %v1197_v44 = vld [vmem:[#allocation3] sm:$0xff] (!%p2282_p2)  ;;  %v1198_v61 = vld [vmem:[#allocation3 + $0x8] sm:$0xff] (!%p2282_p2) }
 0x667   :  { %1196 = sbr.rel (%p2282_p2) target bundleno = 1863 (0x747), region = 33  ;;  %v2796_v38 = vpack.c.bf16 (!%p2282_p2), %v1198_v61, %v1197_v44  ;;  %2598 = vmatprep.mubr.msk.f32.mxu0 (!%p2282_p2), %vm21_vm0, %v1197_v44 }
 0x669   :  { %v1200_v43 = vld [vmem:[#allocation3 + $0x18] sm:$0xff] (!%p2282_p2)  ;;  %2797 = vmatprep.subr.bf16.mxu0 (!%p2282_p2), %v2796_v38  ;;  %2868 = vmatprep.subr.bf16.mxu1 (!%p2282_p2), %v2796_v38 }
 0x66a   :  { %v1199_v37 = vld [vmem:[#allocation3 + $0x10] sm:$0xff] (!%p2282_p2)  ;;  %2799 = vmatpush3.bf16.msra.mxu0 (!%p2282_p2), %v2796_v38  ;;  %2870 = vmatpush3.bf16.msra.mxu1 (!%p2282_p2), %v2796_v38 }
 0x66b   :  { %2601 = vmatprep.mubr.msk.f32.mxu1 (!%p2282_p2), %vm21_vm0, %v1199_v37  ;;  %v2800_v60 = vpack.c.bf16 (!%p2282_p2), %v1200_v43, %v1199_v37 }
 0x66d   :  { %2801 = vmatprep.subr.bf16.mxu0 (!%p2282_p2), %v2800_v60  ;;  %2869 = vmatprep.subr.bf16.mxu1 (!%p2282_p2), %v2800_v60 }
 0x66e   :  { %2803 = vmatpush3.bf16.msra.mxu0 %v2800_v60  ;;  %2871 = vmatpush3.bf16.msra.mxu1 %v2800_v60 }
 0x671   :  { %2599 = vmatmul.mubr.msk.f32.vlgmr.msra.gmra.mrb[0].mxu0 %vm21_vm0, %v1198_v61  ;;  %2602 = vmatmul.mubr.msk.f32.vlgmr.msra.gmra.mrb[0].mxu1 %vm21_vm0, %v1200_v43 }
 0x744   :  { %v2600_v46 = vpop.f32.mrb[0].mxu0  ;;  %v2603_v47 = vpop.f32.mrb[0].mxu1 }
 0x745   :  { %1299 = vst.msk [vmem:[#allocation3 + $0x8] sm:$0xff] %vm21_vm0, %v2600_v46  ;;  %1301 = vst.msk [vmem:[#allocation3 + $0x18] sm:$0xff] %vm21_vm0, %v2603_v47  ;;  %v1279_v48 = vpop.f32.mrb[1].mxu0  ;;  %v1289_v51 = vpop.f32.mrb[1].mxu1 }
 0x746   :  { %1298 = vst.msk [vmem:[#allocation3] sm:$0xff] %vm21_vm0, %v1279_v48  ;;  %1300 = vst.msk [vmem:[#allocation3 + $0x10] sm:$0xff] %vm21_vm0, %v1289_v51 }
 0x747 PF:  { %p2287_p3 = scmp.le.s32.totalorder %s3331_s20, 1 }
 0x749   :  { %1305 = sbr.rel (%p2287_p3) target bundleno = 2094 (0x82e), region = 37 }
 0x74c   :  { %v1307_v53 = vld [vmem:[#allocation3 + $0x8] sm:$0xff] (!%p2287_p3)  ;;  %v1309_v56 = vld [vmem:[#allocation3 + $0x18] sm:$0xff] (!%p2287_p3) }
 0x74d   :  { %v1306_v52 = vld [vmem:[#allocation3] sm:$0xff] (!%p2287_p3)  ;;  %v1308_v54 = vld [vmem:[#allocation3 + $0x10] sm:$0xff] (!%p2287_p3) }
 0x74e   :  { %v2804_v55 = vpack.c.bf16 (!%p2287_p3), %v1307_v53, %v1306_v52  ;;  %2612 = vmatprep.mubr.msk.f32.mxu0 (!%p2287_p3), %vm21_vm0, %v1306_v52  ;;  %2615 = vmatprep.mubr.msk.f32.mxu1 (!%p2287_p3), %vm21_vm0, %v1308_v54  ;;  %v2808_v57 = vpack.c.bf16 (!%p2287_p3), %v1309_v56, %v1308_v54 }
 0x750   :  { %2805 = vmatprep.subr.bf16.mxu0 %v2804_v55  ;;  %2872 = vmatprep.subr.bf16.mxu1 %v2804_v55 }
 0x751   :  { %2807 = vmatpush3.bf16.msra.mxu0 %v2804_v55  ;;  %2874 = vmatpush3.bf16.msra.mxu1 %v2804_v55 }
 0x752   :  { %2809 = vmatprep.subr.bf16.mxu0 %v2808_v57  ;;  %2873 = vmatprep.subr.bf16.mxu1 %v2808_v57 }
 0x755   :  { %2811 = vmatpush3.bf16.msra.mxu0 %v2808_v57  ;;  %2875 = vmatpush3.bf16.msra.mxu1 %v2808_v57 }
 0x758   :  { %2613 = vmatmul.mubr.msk.f32.vlgmr.msra.gmra.mrb[0].mxu0 %vm21_vm0, %v1307_v53  ;;  %2616 = vmatmul.mubr.msk.f32.vlgmr.msra.gmra.mrb[0].mxu1 %vm21_vm0, %v1309_v56 }
 0x82b   :  { %v2614_v58 = vpop.f32.mrb[0].mxu0  ;;  %v2617_v5 = vpop.f32.mrb[0].mxu1 }
 0x82c   :  { %1408 = vst.msk [vmem:[#allocation3 + $0x8] sm:$0xff] %vm21_vm0, %v2614_v58  ;;  %1410 = vst.msk [vmem:[#allocation3 + $0x18] sm:$0xff] %vm21_vm0, %v2617_v5  ;;  %v1388_v6 = vpop.f32.mrb[1].mxu0  ;;  %v1398_v7 = vpop.f32.mrb[1].mxu1 }
 0x82d   :  { %1407 = vst.msk [vmem:[#allocation3] sm:$0xff] %vm21_vm0, %v1388_v6  ;;  %1409 = vst.msk [vmem:[#allocation3 + $0x10] sm:$0xff] %vm21_vm0, %v1398_v7 }
 0x82e PF:  { %p2292_p4 = scmp.le.s32.totalorder %s3331_s20, 2 }
 0x830   :  { %1414 = sbr.rel (%p2292_p4) target bundleno = 2325 (0x915), region = 41 }
 0x833   :  { %v1416_v9 = vld [vmem:[#allocation3 + $0x8] sm:$0xff] (!%p2292_p4)  ;;  %v1418_v12 = vld [vmem:[#allocation3 + $0x18] sm:$0xff] (!%p2292_p4) }
 0x834   :  { %v1415_v8 = vld [vmem:[#allocation3] sm:$0xff] (!%p2292_p4)  ;;  %v1417_v10 = vld [vmem:[#allocation3 + $0x10] sm:$0xff] (!%p2292_p4) }
 0x835   :  { %v2812_v11 = vpack.c.bf16 (!%p2292_p4), %v1416_v9, %v1415_v8  ;;  %2626 = vmatprep.mubr.msk.f32.mxu0 (!%p2292_p4), %vm21_vm0, %v1415_v8  ;;  %2629 = vmatprep.mubr.msk.f32.mxu1 (!%p2292_p4), %vm21_vm0, %v1417_v10  ;;  %v2816_v13 = vpack.c.bf16 (!%p2292_p4), %v1418_v12, %v1417_v10 }
 0x837   :  { %2813 = vmatprep.subr.bf16.mxu0 %v2812_v11  ;;  %2876 = vmatprep.subr.bf16.mxu1 %v2812_v11 }
 0x838   :  { %2815 = vmatpush3.bf16.msra.mxu0 %v2812_v11  ;;  %2878 = vmatpush3.bf16.msra.mxu1 %v2812_v11 }
 0x839   :  { %2817 = vmatprep.subr.bf16.mxu0 %v2816_v13  ;;  %2877 = vmatprep.subr.bf16.mxu1 %v2816_v13 }
 0x83c   :  { %2819 = vmatpush3.bf16.msra.mxu0 %v2816_v13  ;;  %2879 = vmatpush3.bf16.msra.mxu1 %v2816_v13 }
 0x83f   :  { %2627 = vmatmul.mubr.msk.f32.vlgmr.msra.gmra.mrb[0].mxu0 %vm21_vm0, %v1416_v9  ;;  %2630 = vmatmul.mubr.msk.f32.vlgmr.msra.gmra.mrb[0].mxu1 %vm21_vm0, %v1418_v12 }
 0x912   :  { %v2628_v14 = vpop.f32.mrb[0].mxu0  ;;  %v2631_v15 = vpop.f32.mrb[0].mxu1 }
 0x913   :  { %1517 = vst.msk [vmem:[#allocation3 + $0x8] sm:$0xff] %vm21_vm0, %v2628_v14  ;;  %1519 = vst.msk [vmem:[#allocation3 + $0x18] sm:$0xff] %vm21_vm0, %v2631_v15  ;;  %v1497_v17 = vpop.f32.mrb[1].mxu0  ;;  %v1507_v18 = vpop.f32.mrb[1].mxu1 }
 0x914   :  { %1516 = vst.msk [vmem:[#allocation3] sm:$0xff] %vm21_vm0, %v1497_v17  ;;  %1518 = vst.msk [vmem:[#allocation3 + $0x10] sm:$0xff] %vm21_vm0, %v1507_v18 }
 0x915 PF:  { %p2297_p5 = scmp.le.s32.totalorder %s3331_s20, 3 }
 0x917   :  { %1523 = sbr.rel (%p2297_p5) target bundleno = 2556 (0x9fc), region = 45 }
 0x91a   :  { %v1525_v19 = vld [vmem:[#allocation3 + $0x8] sm:$0xff] (!%p2297_p5)  ;;  %v1527_v2 = vld [vmem:[#allocation3 + $0x18] sm:$0xff] (!%p2297_p5) }
 0x91b   :  { %v1524_v16 = vld [vmem:[#allocation3] sm:$0xff] (!%p2297_p5)  ;;  %v1526_v1 = vld [vmem:[#allocation3 + $0x10] sm:$0xff] (!%p2297_p5) }
 0x91c   :  { %v2820_v20 = vpack.c.bf16 (!%p2297_p5), %v1525_v19, %v1524_v16  ;;  %2640 = vmatprep.mubr.msk.f32.mxu0 (!%p2297_p5), %vm21_vm0, %v1524_v16  ;;  %2643 = vmatprep.mubr.msk.f32.mxu1 (!%p2297_p5), %vm21_vm0, %v1526_v1  ;;  %v2824_v21 = vpack.c.bf16 (!%p2297_p5), %v1527_v2, %v1526_v1 }
 0x91e   :  { %2821 = vmatprep.subr.bf16.mxu0 %v2820_v20  ;;  %2880 = vmatprep.subr.bf16.mxu1 %v2820_v20 }
 0x91f   :  { %2823 = vmatpush3.bf16.msra.mxu0 %v2820_v20  ;;  %2882 = vmatpush3.bf16.msra.mxu1 %v2820_v20 }
 0x920   :  { %2825 = vmatprep.subr.bf16.mxu0 %v2824_v21  ;;  %2881 = vmatprep.subr.bf16.mxu1 %v2824_v21 }
 0x923   :  { %2827 = vmatpush3.bf16.msra.mxu0 %v2824_v21  ;;  %2883 = vmatpush3.bf16.msra.mxu1 %v2824_v21 }
 0x926   :  { %2641 = vmatmul.mubr.msk.f32.vlgmr.msra.gmra.mrb[0].mxu0 %vm21_vm0, %v1525_v19  ;;  %2644 = vmatmul.mubr.msk.f32.vlgmr.msra.gmra.mrb[0].mxu1 %vm21_vm0, %v1527_v2 }
 0x9f9   :  { %v2642_v22 = vpop.f32.mrb[0].mxu0  ;;  %v2645_v23 = vpop.f32.mrb[0].mxu1 }
 0x9fa   :  { %1626 = vst.msk [vmem:[#allocation3 + $0x8] sm:$0xff] %vm21_vm0, %v2642_v22  ;;  %1628 = vst.msk [vmem:[#allocation3 + $0x18] sm:$0xff] %vm21_vm0, %v2645_v23  ;;  %v1606_v24 = vpop.f32.mrb[1].mxu0  ;;  %v1616_v4 = vpop.f32.mrb[1].mxu1 }
 0x9fb   :  { %1625 = vst.msk [vmem:[#allocation3] sm:$0xff] %vm21_vm0, %v1606_v24  ;;  %1627 = vst.msk [vmem:[#allocation3 + $0x10] sm:$0xff] %vm21_vm0, %v1616_v4 }
 0x9fc PF:  { %p2302_p6 = scmp.le.s32.totalorder %s3331_s20, 4 }
 0x9fe   :  { %1632 = sbr.rel (%p2302_p6) target bundleno = 2787 (0xae3), region = 49 }
 0xa01   :  { %v1634_v26 = vld [vmem:[#allocation3 + $0x8] sm:$0xff] (!%p2302_p6)  ;;  %v1636_v31 = vld [vmem:[#allocation3 + $0x18] sm:$0xff] (!%p2302_p6) }
 0xa02   :  { %v1633_v25 = vld [vmem:[#allocation3] sm:$0xff] (!%p2302_p6)  ;;  %v1635_v29 = vld [vmem:[#allocation3 + $0x10] sm:$0xff] (!%p2302_p6) }
 0xa03   :  { %v2828_v30 = vpack.c.bf16 (!%p2302_p6), %v1634_v26, %v1633_v25  ;;  %2654 = vmatprep.mubr.msk.f32.mxu0 (!%p2302_p6), %vm21_vm0, %v1633_v25  ;;  %2657 = vmatprep.mubr.msk.f32.mxu1 (!%p2302_p6), %vm21_vm0, %v1635_v29  ;;  %v2832_v32 = vpack.c.bf16 (!%p2302_p6), %v1636_v31, %v1635_v29 }
 0xa05   :  { %2829 = vmatprep.subr.bf16.mxu0 %v2828_v30  ;;  %2884 = vmatprep.subr.bf16.mxu1 %v2828_v30 }
 0xa06   :  { %2831 = vmatpush3.bf16.msra.mxu0 %v2828_v30  ;;  %2886 = vmatpush3.bf16.msra.mxu1 %v2828_v30 }
 0xa07   :  { %2833 = vmatprep.subr.bf16.mxu0 %v2832_v32  ;;  %2885 = vmatprep.subr.bf16.mxu1 %v2832_v32 }
 0xa0a   :  { %2835 = vmatpush3.bf16.msra.mxu0 %v2832_v32  ;;  %2887 = vmatpush3.bf16.msra.mxu1 %v2832_v32 }
 0xa0d   :  { %2655 = vmatmul.mubr.msk.f32.vlgmr.msra.gmra.mrb[0].mxu0 %vm21_vm0, %v1634_v26  ;;  %2658 = vmatmul.mubr.msk.f32.vlgmr.msra.gmra.mrb[0].mxu1 %vm21_vm0, %v1636_v31 }
 0xae0   :  { %v2656_v3 = vpop.f32.mrb[0].mxu0  ;;  %v2659_v33 = vpop.f32.mrb[0].mxu1 }
 0xae1   :  { %1735 = vst.msk [vmem:[#allocation3 + $0x8] sm:$0xff] %vm21_vm0, %v2656_v3  ;;  %1737 = vst.msk [vmem:[#allocation3 + $0x18] sm:$0xff] %vm21_vm0, %v2659_v33  ;;  %v1715_v34 = vpop.f32.mrb[1].mxu0  ;;  %v1725_v59 = vpop.f32.mrb[1].mxu1 }
 0xae2   :  { %1734 = vst.msk [vmem:[#allocation3] sm:$0xff] %vm21_vm0, %v1715_v34  ;;  %1736 = vst.msk [vmem:[#allocation3 + $0x10] sm:$0xff] %vm21_vm0, %v1725_v59 }
 0xae3 PF:  { %p2307_p7 = scmp.le.s32.totalorder %s3331_s20, 5 }
 0xae5   :  { %1741 = sbr.rel (%p2307_p7) target bundleno = 3018 (0xbca), region = 53 }
 0xae8   :  { %v1743_v0 = vld [vmem:[#allocation3 + $0x8] sm:$0xff] (!%p2307_p7)  ;;  %v1745_v36 = vld [vmem:[#allocation3 + $0x18] sm:$0xff] (!%p2307_p7) }
 0xae9   :  { %v1742_v39 = vld [vmem:[#allocation3] sm:$0xff] (!%p2307_p7)  ;;  %v1744_v63 = vld [vmem:[#allocation3 + $0x10] sm:$0xff] (!%p2307_p7) }
 0xaea   :  { %v2836_v40 = vpack.c.bf16 (!%p2307_p7), %v1743_v0, %v1742_v39  ;;  %2668 = vmatprep.mubr.msk.f32.mxu0 (!%p2307_p7), %vm21_vm0, %v1742_v39  ;;  %2671 = vmatprep.mubr.msk.f32.mxu1 (!%p2307_p7), %vm21_vm0, %v1744_v63  ;;  %v2840_v50 = vpack.c.bf16 (!%p2307_p7), %v1745_v36, %v1744_v63 }
 0xaec   :  { %2837 = vmatprep.subr.bf16.mxu0 %v2836_v40  ;;  %2888 = vmatprep.subr.bf16.mxu1 %v2836_v40 }
 0xaed   :  { %2839 = vmatpush3.bf16.msra.mxu0 %v2836_v40  ;;  %2890 = vmatpush3.bf16.msra.mxu1 %v2836_v40 }
 0xaee   :  { %2841 = vmatprep.subr.bf16.mxu0 %v2840_v50  ;;  %2889 = vmatprep.subr.bf16.mxu1 %v2840_v50 }
 0xaf1   :  { %2843 = vmatpush3.bf16.msra.mxu0 %v2840_v50  ;;  %2891 = vmatpush3.bf16.msra.mxu1 %v2840_v50 }
 0xaf4   :  { %2669 = vmatmul.mubr.msk.f32.vlgmr.msra.gmra.mrb[0].mxu0 %vm21_vm0, %v1743_v0  ;;  %2672 = vmatmul.mubr.msk.f32.vlgmr.msra.gmra.mrb[0].mxu1 %vm21_vm0, %v1745_v36 }
 0xbc7   :  { %v2670_v27 = vpop.f32.mrb[0].mxu0  ;;  %v2673_v41 = vpop.f32.mrb[0].mxu1 }
 0xbc8   :  { %1844 = vst.msk [vmem:[#allocation3 + $0x8] sm:$0xff] %vm21_vm0, %v2670_v27  ;;  %1846 = vst.msk [vmem:[#allocation3 + $0x18] sm:$0xff] %vm21_vm0, %v2673_v41  ;;  %v1824_v42 = vpop.f32.mrb[1].mxu0  ;;  %v1834_v35 = vpop.f32.mrb[1].mxu1 }
 0xbc9   :  { %1843 = vst.msk [vmem:[#allocation3] sm:$0xff] %vm21_vm0, %v1824_v42  ;;  %1845 = vst.msk [vmem:[#allocation3 + $0x10] sm:$0xff] %vm21_vm0, %v1834_v35 }
 0xbca PF:  { %p2312_p8 = scmp.le.s32.totalorder %s3331_s20, 6 }
 0xbcc   :  { %1850 = sbr.rel (%p2312_p8) target bundleno = 3249 (0xcb1), region = 57 }
 0xbcf   :  { %v1852_v45 = vld [vmem:[#allocation3 + $0x8] sm:$0xff] (!%p2312_p8)  ;;  %v1854_v44 = vld [vmem:[#allocation3 + $0x18] sm:$0xff] (!%p2312_p8) }
 0xbd0   :  { %v1851_v49 = vld [vmem:[#allocation3] sm:$0xff] (!%p2312_p8)  ;;  %v1853_v62 = vld [vmem:[#allocation3 + $0x10] sm:$0xff] (!%p2312_p8) }
 0xbd1   :  { %v2844_v28 = vpack.c.bf16 (!%p2312_p8), %v1852_v45, %v1851_v49  ;;  %2682 = vmatprep.mubr.msk.f32.mxu0 (!%p2312_p8), %vm21_vm0, %v1851_v49  ;;  %2685 = vmatprep.mubr.msk.f32.mxu1 (!%p2312_p8), %vm21_vm0, %v1853_v62  ;;  %v2848_v61 = vpack.c.bf16 (!%p2312_p8), %v1854_v44, %v1853_v62 }
 0xbd3   :  { %2845 = vmatprep.subr.bf16.mxu0 %v2844_v28  ;;  %2892 = vmatprep.subr.bf16.mxu1 %v2844_v28 }
 0xbd4   :  { %2847 = vmatpush3.bf16.msra.mxu0 %v2844_v28  ;;  %2894 = vmatpush3.bf16.msra.mxu1 %v2844_v28 }
 0xbd5   :  { %2849 = vmatprep.subr.bf16.mxu0 %v2848_v61  ;;  %2893 = vmatprep.subr.bf16.mxu1 %v2848_v61 }
 0xbd8   :  { %2851 = vmatpush3.bf16.msra.mxu0 %v2848_v61  ;;  %2895 = vmatpush3.bf16.msra.mxu1 %v2848_v61 }
 0xbdb   :  { %2683 = vmatmul.mubr.msk.f32.vlgmr.msra.gmra.mrb[0].mxu0 %vm21_vm0, %v1852_v45  ;;  %2686 = vmatmul.mubr.msk.f32.vlgmr.msra.gmra.mrb[0].mxu1 %vm21_vm0, %v1854_v44 }
 0xcae   :  { %v2684_v37 = vpop.f32.mrb[0].mxu0  ;;  %v2687_v38 = vpop.f32.mrb[0].mxu1 }
 0xcaf   :  { %1953 = vst.msk [vmem:[#allocation3 + $0x8] sm:$0xff] %vm21_vm0, %v2684_v37  ;;  %1955 = vst.msk [vmem:[#allocation3 + $0x18] sm:$0xff] %vm21_vm0, %v2687_v38  ;;  %v1933_v43 = vpop.f32.mrb[1].mxu0  ;;  %v1943_v60 = vpop.f32.mrb[1].mxu1 }
 0xcb0   :  { %1952 = vst.msk [vmem:[#allocation3] sm:$0xff] %vm21_vm0, %v1933_v43  ;;  %1954 = vst.msk [vmem:[#allocation3 + $0x10] sm:$0xff] %vm21_vm0, %v1943_v60 }
 0xcb1 PF:  { %p2317_p9 = scmp.le.s32.totalorder %s3331_s20, 7 }
 0xcb3   :  { %1959 = sbr.rel (%p2317_p9) target bundleno = 3480 (0xd98), region = 61 }
 0xcb6   :  { %v1961_v47 = vld [vmem:[#allocation3 + $0x8] sm:$0xff] (!%p2317_p9)  ;;  %v1963_v52 = vld [vmem:[#allocation3 + $0x18] sm:$0xff] (!%p2317_p9) }
 0xcb7   :  { %v1960_v46 = vld [vmem:[#allocation3] sm:$0xff] (!%p2317_p9)  ;;  %v1962_v48 = vld [vmem:[#allocation3 + $0x10] sm:$0xff] (!%p2317_p9) }
 0xcb8   :  { %v2852_v51 = vpack.c.bf16 (!%p2317_p9), %v1961_v47, %v1960_v46  ;;  %2696 = vmatprep.mubr.msk.f32.mxu0 (!%p2317_p9), %vm21_vm0, %v1960_v46  ;;  %2699 = vmatprep.mubr.msk.f32.mxu1 (!%p2317_p9), %vm21_vm0, %v1962_v48  ;;  %v2856_v53 = vpack.c.bf16 (!%p2317_p9), %v1963_v52, %v1962_v48 }
 0xcba   :  { %2853 = vmatprep.subr.bf16.mxu0 %v2852_v51  ;;  %2896 = vmatprep.subr.bf16.mxu1 %v2852_v51 }
 0xcbb   :  { %2855 = vmatpush3.bf16.msra.mxu0 %v2852_v51  ;;  %2898 = vmatpush3.bf16.msra.mxu1 %v2852_v51 }
 0xcbc   :  { %2857 = vmatprep.subr.bf16.mxu0 %v2856_v53  ;;  %2897 = vmatprep.subr.bf16.mxu1 %v2856_v53 }
 0xcbf   :  { %2859 = vmatpush3.bf16.msra.mxu0 %v2856_v53  ;;  %2899 = vmatpush3.bf16.msra.mxu1 %v2856_v53 }
 0xcc2   :  { %2697 = vmatmul.mubr.msk.f32.vlgmr.msra.gmra.mrb[0].mxu0 %vm21_vm0, %v1961_v47  ;;  %2700 = vmatmul.mubr.msk.f32.vlgmr.msra.gmra.mrb[0].mxu1 %vm21_vm0, %v1963_v52 }
 0xd95   :  { %v2698_v54 = vpop.f32.mrb[0].mxu0  ;;  %v2701_v55 = vpop.f32.mrb[0].mxu1 }
 0xd96   :  { %2062 = vst.msk [vmem:[#allocation3 + $0x8] sm:$0xff] %vm21_vm0, %v2698_v54  ;;  %2064 = vst.msk [vmem:[#allocation3 + $0x18] sm:$0xff] %vm21_vm0, %v2701_v55  ;;  %v2042_v56 = vpop.f32.mrb[1].mxu0  ;;  %v2052_v57 = vpop.f32.mrb[1].mxu1 }
 0xd97   :  { %2061 = vst.msk [vmem:[#allocation3] sm:$0xff] %vm21_vm0, %v2042_v56  ;;  %2063 = vst.msk [vmem:[#allocation3 + $0x10] sm:$0xff] %vm21_vm0, %v2052_v57 }
 0xd98 PF:  { %p2322_p10 = scmp.le.s32.totalorder %s3331_s20, 8 }
 0xd9a   :  { %2068 = sbr.rel (%p2322_p10) target bundleno = 3711 (0xe7f), region = 65 }
 0xd9d   :  { %v2070_v5 = vld [vmem:[#allocation3 + $0x8] sm:$0xff] (!%p2322_p10)  ;;  %v2072_v8 = vld [vmem:[#allocation3 + $0x18] sm:$0xff] (!%p2322_p10) }
 0xd9e   :  { %v2069_v58 = vld [vmem:[#allocation3] sm:$0xff] (!%p2322_p10)  ;;  %v2071_v6 = vld [vmem:[#allocation3 + $0x10] sm:$0xff] (!%p2322_p10) }
 0xd9f   :  { %v2860_v7 = vpack.c.bf16 (!%p2322_p10), %v2070_v5, %v2069_v58  ;;  %2710 = vmatprep.mubr.msk.f32.mxu0 (!%p2322_p10), %vm21_vm0, %v2069_v58  ;;  %2713 = vmatprep.mubr.msk.f32.mxu1 (!%p2322_p10), %vm21_vm0, %v2071_v6  ;;  %v2864_v9 = vpack.c.bf16 (!%p2322_p10), %v2072_v8, %v2071_v6 }
 0xda1   :  { %2861 = vmatprep.subr.bf16.mxu0 %v2860_v7  ;;  %2900 = vmatprep.subr.bf16.mxu1 %v2860_v7 }
 0xda2   :  { %2863 = vmatpush3.bf16.msra.mxu0 %v2860_v7  ;;  %2902 = vmatpush3.bf16.msra.mxu1 %v2860_v7 }
 0xda3   :  { %2865 = vmatprep.subr.bf16.mxu0 %v2864_v9  ;;  %2901 = vmatprep.subr.bf16.mxu1 %v2864_v9 }
 0xda6   :  { %2867 = vmatpush3.bf16.msra.mxu0 %v2864_v9  ;;  %2903 = vmatpush3.bf16.msra.mxu1 %v2864_v9 }
 0xda9   :  { %2711 = vmatmul.mubr.msk.f32.vlgmr.msra.gmra.mrb[0].mxu0 %vm21_vm0, %v2070_v5  ;;  %2714 = vmatmul.mubr.msk.f32.vlgmr.msra.gmra.mrb[0].mxu1 %vm21_vm0, %v2072_v8 }
 0xe7c   :  { %v2712_v10 = vpop.f32.mrb[0].mxu0  ;;  %v2715_v11 = vpop.f32.mrb[0].mxu1 }
 0xe7d   :  { %2171 = vst.msk [vmem:[#allocation3 + $0x8] sm:$0xff] %vm21_vm0, %v2712_v10  ;;  %2173 = vst.msk [vmem:[#allocation3 + $0x18] sm:$0xff] %vm21_vm0, %v2715_v11  ;;  %v2151_v12 = vpop.f32.mrb[1].mxu0  ;;  %v2161_v13 = vpop.f32.mrb[1].mxu1 }
 0xe7e   :  { %2170 = vst.msk [vmem:[#allocation3] sm:$0xff] %vm21_vm0, %v2151_v12  ;;  %2172 = vst.msk [vmem:[#allocation3 + $0x10] sm:$0xff] %vm21_vm0, %v2161_v13 }
 0xe7f PF:  { %2176 = sbr.rel (%p2272_p1) target bundleno = 4073 (0xfe9), region = 69 }
 0xe84   :  { %v2178_v15 = vld [vmem:[#allocation3 + $0x8] sm:$0xff] (!%p2272_p1)  ;;  %v2180_v18 = vld [vmem:[#allocation3 + $0x18] sm:$0xff] (!%p2272_p1) }
 0xe85   :  { %v2177_v14 = vld [vmem:[#allocation3] sm:$0xff] (!%p2272_p1)  ;;  %v2179_v17 = vld [vmem:[#allocation3 + $0x10] sm:$0xff] (!%p2272_p1) }
 0xe86   :  { %2181 = vxpose.xlu0.b32.start [1/4] (short) (narrow) %v2177_v14, 32 }
 0xe8a   :  { %2182 = vxpose.xlu0.b32.cont [2/4] (short) (narrow) %v2178_v15, 32 }
 0xe8e   :  { %2183 = vxpose.xlu0.b32.cont [3/4] (short) (narrow) %v2179_v17, 32 }
 0xe92   :  { %2184 = vxpose.xlu0.b32.end [4/4] (short) (narrow) %v2180_v18, 32 }
 0xf06   :  { %v2197_v16 = vpop.trf.xlu0 }
 0xf07   :  { %v2213_v20 = vmul.f32 %v2197_v16, %v2177_v14 }
 0xf09   :  { %v2217_v23 = vsel %vm21_vm0, %v2213_v20, 0.0 }
 0xf0a   :  { %v2198_v19 = vpop.trf.xlu0 }
 0xf0b   :  { %v2214_v1 = vmul.f32 %v2198_v19, %v2178_v15 }
 0xf0d   :  { %v2218_v21 = vsel %vm21_vm0, %v2214_v1, 0.0 }
 0xf0e   :  { %v2199_v2 = vpop.trf.xlu0  ;;  %v2219_v4 = vadd.f32 %v2218_v21, %v2217_v23 }
 0xf0f   :  { %v2215_v22 = vmul.f32 %v2199_v2, %v2179_v17 }
 0xf11   :  { %v2220_v24 = vsel %vm21_vm0, %v2215_v22, 0.0 }
 0xf12   :  { %v2200_v25 = vpop.trf.xlu0  ;;  %v2221_v29 = vadd.f32 %v2220_v24, %v2219_v4 }
 0xf13   :  { %v2216_v26 = vmul.f32 %v2200_v25, %v2180_v18 }
 0xf15   :  { %v2222_v30 = vsel %vm21_vm0, %v2216_v26, 0.0 }
 0xf16   :  { %v2223_v31 = vadd.f32 %v2222_v30, %v2221_v29 }
 0xf18   :  { %2224 = vadd.xlane.f32.xlu1 %v2223_v31 }
 0xfa5   :  { %v2225_v32 = vpop.xlane.xlu1 %2224 }
 0xfa6   :  { %v2226_v3 = vrot.slane %v2225_v32, 4 }
 0xfa8   :  { %v2227_v33 = vadd.f32 %v2226_v3, %v2225_v32 }
 0xfaa   :  { %v2228_v34 = vrot.slane %v2227_v33, 2 }
 0xfac   :  { %v2229_v59 = vadd.f32 %v2228_v34, %v2227_v33 }
 0xfae   :  { %v2230_v39 = vrot.slane %v2229_v59, 1 }
 0xfb0   :  { %v2231_v0 = vadd.f32 %v2230_v39, %v2229_v59 }
 0xfb2   :  { %2924 = vpush %v2231_v0 }
 0xfe3   :  { %s2925_s0 = spop %2924 }
 0xfe4   :  { %s2233_s22 = smul.f32 5.0, %s2925_s0 }
 0xfe6   :  { %s2234_s23 = sadd.f32 %s2270_s13, %s2233_s22 }
 0xfe8   :  { %2236 = sst [smem:[#allocation6]] %s2234_s23 }
 0xfe9 PF:  { %s2930_s26 = scalar_lea.hbm %s3440_s4, 16 }
 0xfea   :  { %p2931_p11 = scmp.ne.s32.totalorder %s3440_s4, %s2930_s26  ;;  %p2934_p12 = scmp.lt.u32.totalorder %s2930_s26, %s3440_s4 }
 0xfec   :  { %p2936_p13 = pnand %p2934_p12, %p2931_p11 }
 0xfee   :  { %2939 = shalt.err (!%p2936_p13)
}
 0xfef   :  { %s2943_s30 = smov [#allocation6]  }
 0xff0   :  { %2244 = dma.smem_to_hbm %s2943_s30, 16, %s3440_s4, [#allocation7]  }
 0xff1   :  { %2940 = dma.done.wait [#allocation7], 16  }
 0xff2   :  { %2941 = vsyncadd [#allocation7], 4294967280 }
 0xff3   :  { %2248 = sfence }
 0xff4   :  { %2249 = vsyncpa [#allocation7], 1 }

</bundles_post_ra>
